<compile_context>
chip_gen: v6e
topology: v6e:2x2x1
jax: 0.10.0
libtpu: 0.0.40
codegen_flags: <defaults>
</compile_context>

<pallas_src>
import jax
import jax.numpy as jnp
from jax.experimental import pallas as pl
from jax.experimental.pallas import tpu as pltpu

NUM_HIDDEN = 32
IN_DIM = 784
MID_DIM = 256
SMALL_W = 128          # lane-dense slab: [enc(32) | mu(32) | logvar(32) | pad(32)]
MAX_TILE_B = 1024      # batch rows per grid step (cap); ~13 MiB live VMEM at 1024


def _vae_kernel(
    x_ref, eps_ref,                 # pipelined per-batch-tile inputs
    w1_ref, b1_ref,                 # encoder: 784 -> 256
    w2_ref, b2_ref,                 # encoder: 256 -> 32
    wh_ref, bh_ref,                 # fused [mu | logvar] head: 32 -> 64
    w3_ref, b3_ref,                 # decoder: 32 -> 256
    w4_ref, b4_ref,                 # decoder: 256 -> 784
    small_ref, dec_ref,             # outputs: [TB,128] fp32 slab, [TB,784] bf16
):
    x = x_ref[...].astype(jnp.bfloat16)                              # cast in-kernel

    # encoder
    h1 = jnp.dot(x, w1_ref[...], preferred_element_type=jnp.float32) + b1_ref[...]
    h1 = jnp.maximum(h1, 0.0).astype(jnp.bfloat16)
    enc = jnp.dot(h1, w2_ref[...], preferred_element_type=jnp.float32) + b2_ref[...]
    enc = jnp.maximum(enc, 0.0)                                      # fp32 [TB, 32]

    # fused mu / logvar head (single MXU push instead of two 32x32 ones)
    mulv = jnp.dot(enc.astype(jnp.bfloat16), wh_ref[...],
                   preferred_element_type=jnp.float32) + bh_ref[...]  # [TB, 64]
    mu = mulv[:, :NUM_HIDDEN]
    lv = mulv[:, NUM_HIDDEN:]

    # reparametrize: z = mu + eps * exp(0.5 * logvar)   (fp32)
    z = mu + eps_ref[...] * jnp.exp(0.5 * lv)

    # decoder
    h3 = jnp.dot(z.astype(jnp.bfloat16), w3_ref[...],
                 preferred_element_type=jnp.float32) + b3_ref[...]
    h3 = jnp.maximum(h3, 0.0).astype(jnp.bfloat16)
    logits = jnp.dot(h3, w4_ref[...], preferred_element_type=jnp.float32) + b4_ref[...]

    # fp32 sigmoid (valid on v5e which lacks bf16 EUP); bf16 store halves the
    # dominant HBM write stream.  On v6e/v7x the sigmoid could run in bf16 too.
    dec_ref[...] = jax.nn.sigmoid(logits).astype(dec_ref.dtype)      # [TB, 784] bf16

    # lane-dense packed small outputs via direct sub-slice stores
    small_ref[:, :NUM_HIDDEN] = enc
    small_ref[:, NUM_HIDDEN:3 * NUM_HIDDEN] = mulv
    small_ref[:, 3 * NUM_HIDDEN:] = jnp.zeros(
        (enc.shape[0], SMALL_W - 3 * NUM_HIDDEN), jnp.float32)


def _choose_tile_b(batch):
    """>=8 rows (sublane), <=MAX_TILE_B, and aim for >=2 grid steps so v7x's
    two TensorCores both get work; avoids padding tiny batches up to 256+."""
    half = -(-batch // 2)                  # cdiv(batch, 2)
    tb = ((half + 7) // 8) * 8             # round up to a multiple of 8
    return max(8, min(MAX_TILE_B, tb))


@jax.jit
def vae_forward(x, packed_params, eps):
    B = x.shape[0]
    tile_b = _choose_tile_b(B)
    nb = pl.cdiv(B, tile_b)
    B_pad = nb * tile_b

    if B_pad != B:                          # minimal row padding only when needed
        x_in = jnp.zeros((B_pad, IN_DIM), x.dtype).at[:B].set(x)
        eps_in = jnp.zeros((B_pad, NUM_HIDDEN), jnp.float32).at[:B].set(eps)
    else:
        x_in, eps_in = x, eps.astype(jnp.float32)

    (w1, b1, w2, b2, wh, bh, w3, b3, w4, b4) = packed_params

    def tiled(width):
        return pl.BlockSpec((tile_b, width), lambda i: (i, 0))

    def resident(arr):          # weights/biases: loaded once, stay in VMEM
        return pl.BlockSpec(arr.shape, lambda i: (0, 0))

    in_specs = [
        tiled(IN_DIM),                       # x tile (fp32, unpadded width)
        tiled(NUM_HIDDEN),                   # eps tile
        resident(w1), resident(b1),
        resident(w2), resident(b2),
        resident(wh), resident(bh),
        resident(w3), resident(b3),
        resident(w4), resident(b4),
    ]
    out_specs = (
        tiled(SMALL_W),                      # enc|mu|logvar slab (fp32)
        tiled(IN_DIM),                       # decoded (bf16, unpadded width)
    )
    out_shape = (
        jax.ShapeDtypeStruct((B_pad, SMALL_W), jnp.float32),
        jax.ShapeDtypeStruct((B_pad, IN_DIM), jnp.bfloat16),
    )

    # advisory cost estimate so XLA schedules neighbours sensibly
    flops = 2 * B_pad * (IN_DIM * MID_DIM + MID_DIM * NUM_HIDDEN
                         + NUM_HIDDEN * 2 * NUM_HIDDEN
                         + NUM_HIDDEN * MID_DIM + MID_DIM * IN_DIM)
    weight_bytes = sum(int(a.size) * a.dtype.itemsize
                       for a in (w1, b1, w2, b2, wh, bh, w3, b3, w4, b4))
    bytes_accessed = B_pad * (IN_DIM * 4 + NUM_HIDDEN * 4
                              + SMALL_W * 4 + IN_DIM * 2) + weight_bytes
    cost = pl.CostEstimate(flops=flops,
                           transcendentals=B_pad * (NUM_HIDDEN + IN_DIM),
                           bytes_accessed=bytes_accessed)

    small, dec_p = pl.pallas_call(
        _vae_kernel,
        grid=(nb,),
        in_specs=in_specs,
        out_specs=out_specs,
        out_shape=out_shape,
        compiler_params=pltpu.CompilerParams(
            dimension_semantics=("parallel",),      # megacore batch split
            vmem_limit_bytes=48 * 1024 * 1024,      # headroom for 1024-row tiles
        ),
        cost_estimate=cost,
    )(x_in, eps_in, w1, b1, w2, b2, wh, bh, w3, b3, w4, b4)

    enc = small[:B, :NUM_HIDDEN]
    mu = small[:B, NUM_HIDDEN:2 * NUM_HIDDEN]
    logvar = small[:B, 2 * NUM_HIDDEN:3 * NUM_HIDDEN]
    dec = dec_p if B_pad == B else dec_p[:B]        # bf16, no column slice needed
    return enc, dec, mu, logvar


def init_params(key):
    """Deterministic PyTorch-Linear-style init: U(-1/sqrt(fan_in), 1/sqrt(fan_in))."""
    def linear(key, fan_in, fan_out):
        kw, kb = jax.random.split(key)
        bound = 1.0 / jnp.sqrt(fan_in)
        w = jax.random.uniform(kw, (fan_in, fan_out), jnp.float32, -bound, bound)
        b = jax.random.uniform(kb, (1, fan_out), jnp.float32, -bound, bound)
        return w, b

    keys = jax.random.split(key, 6)
    w1, b1 = linear(keys[0], IN_DIM, MID_DIM)        # encoder.0
    w2, b2 = linear(keys[1], MID_DIM, NUM_HIDDEN)    # encoder.2
    wmu, bmu = linear(keys[2], NUM_HIDDEN, NUM_HIDDEN)
    wlv, blv = linear(keys[3], NUM_HIDDEN, NUM_HIDDEN)
    w3, b3 = linear(keys[4], NUM_HIDDEN, MID_DIM)    # decoder.0
    w4, b4 = linear(keys[5], MID_DIM, IN_DIM)        # decoder.2
    return (w1, b1, w2, b2, wmu, bmu, wlv, blv, w3, b3, w4, b4)


def pack_params(params):
    """Cast weights to bf16 and fuse the mu|logvar heads. Done once, no padding."""
    (w1, b1, w2, b2, wmu, bmu, wlv, blv, w3, b3, w4, b4) = params
    wh = jnp.concatenate([wmu, wlv], axis=1).astype(jnp.bfloat16)    # [32, 64]
    bh = jnp.concatenate([bmu, blv], axis=1)                         # [1, 64] fp32
    return (w1.astype(jnp.bfloat16), b1,
            w2.astype(jnp.bfloat16), b2,
            wh, bh,
            w3.astype(jnp.bfloat16), b3,
            w4.astype(jnp.bfloat16), b4)


def vae_reference(x, params, eps):
    """Pure-JAX reference using the same bf16-matmul / fp32-accumulate recipe."""
    (w1, b1, w2, b2, wmu, bmu, wlv, blv, w3, b3, w4, b4) = params
    bf = lambda a: a.astype(jnp.bfloat16)
    dot = lambda a, b: jnp.dot(bf(a), bf(b), preferred_element_type=jnp.float32)
    h1 = jnp.maximum(dot(x, w1) + b1, 0.0)
    enc = jnp.maximum(dot(h1, w2) + b2, 0.0)
    mu = dot(enc, wmu) + bmu
    lv = dot(enc, wlv) + blv
    z = mu + eps * jnp.exp(0.5 * lv)
    h3 = jnp.maximum(dot(z, w3) + b3, 0.0)
    dec = jax.nn.sigmoid(dot(h3, w4) + b4)
    return enc, dec, mu, lv


if __name__ == "__main__":
    key = jax.random.PRNGKey(0)
    k_params, k_x, k_eps = jax.random.split(key, 3)

    B = 8
    params = init_params(k_params)
    packed = pack_params(params)
    x = jax.random.uniform(k_x, (B, IN_DIM), jnp.float32)            # pixel-like input
    eps = jax.random.normal(k_eps, (B, NUM_HIDDEN), jnp.float32)     # reparam noise

    enc, dec, mu, lv = vae_forward(x, packed, eps)
    jax.block_until_ready((enc, dec, mu, lv))

    # sanity check against a pure-JAX bf16 reference (bf16 output loosens dec tol)
    enc_r, dec_r, mu_r, lv_r = vae_reference(x, params, eps)
    assert enc.shape == (B, NUM_HIDDEN) and dec.shape == (B, IN_DIM)
    assert jnp.allclose(enc, enc_r, atol=1e-2)
    assert jnp.allclose(dec.astype(jnp.float32), dec_r, atol=2e-2)
    assert jnp.allclose(mu, mu_r, atol=1e-2)
    assert jnp.allclose(lv, lv_r, atol=1e-2)

    print("KERNEL_OK")
</pallas_src>

<mosaic_0001>
module attributes {stable_mosaic.version = 11 : i64} {
  func.func @_vae_kernel(%arg0: i32, %arg1: memref<8x784xf32, #tpu.memory_space<vmem>>, %arg2: memref<8x32xf32, #tpu.memory_space<vmem>>, %arg3: memref<784x256xbf16, #tpu.memory_space<vmem>>, %arg4: memref<1x256xf32, #tpu.memory_space<vmem>>, %arg5: memref<256x32xbf16, #tpu.memory_space<vmem>>, %arg6: memref<1x32xf32, #tpu.memory_space<vmem>>, %arg7: memref<32x64xbf16, #tpu.memory_space<vmem>>, %arg8: memref<1x64xf32, #tpu.memory_space<vmem>>, %arg9: memref<32x256xbf16, #tpu.memory_space<vmem>>, %arg10: memref<1x256xf32, #tpu.memory_space<vmem>>, %arg11: memref<256x784xbf16, #tpu.memory_space<vmem>>, %arg12: memref<1x784xf32, #tpu.memory_space<vmem>>, %arg13: memref<8x128xf32, #tpu.memory_space<vmem>>, %arg14: memref<8x784xbf16, #tpu.memory_space<vmem>>) attributes {dimension_semantics = [#tpu.dimension_semantics<parallel>], iteration_bounds = array<i64: 1>, scalar_prefetch = 0 : i64, scratch_operands = 0 : i64, tpu.core_type = #tpu.core_type<tc>, window_params = [{transform_indices = @transform_0, window_bounds = array<i64: 8, 784>}, {transform_indices = @transform_1, window_bounds = array<i64: 8, 32>}, {pipeline_mode = #tpu.pipeline_mode<synchronous>, transform_indices = @transform_2, window_bounds = array<i64: 784, 256>}, {pipeline_mode = #tpu.pipeline_mode<synchronous>, transform_indices = @transform_3, window_bounds = array<i64: 1, 256>}, {pipeline_mode = #tpu.pipeline_mode<synchronous>, transform_indices = @transform_4, window_bounds = array<i64: 256, 32>}, {pipeline_mode = #tpu.pipeline_mode<synchronous>, transform_indices = @transform_5, window_bounds = array<i64: 1, 32>}, {pipeline_mode = #tpu.pipeline_mode<synchronous>, transform_indices = @transform_6, window_bounds = array<i64: 32, 64>}, {pipeline_mode = #tpu.pipeline_mode<synchronous>, transform_indices = @transform_7, window_bounds = array<i64: 1, 64>}, {pipeline_mode = #tpu.pipeline_mode<synchronous>, transform_indices = @transform_8, window_bounds = array<i64: 32, 256>}, {pipeline_mode = #tpu.pipeline_mode<synchronous>, transform_indices = @transform_9, window_bounds = array<i64: 1, 256>}, {pipeline_mode = #tpu.pipeline_mode<synchronous>, transform_indices = @transform_10, window_bounds = array<i64: 256, 784>}, {pipeline_mode = #tpu.pipeline_mode<synchronous>, transform_indices = @transform_11, window_bounds = array<i64: 1, 784>}, {transform_indices = @transform_12, window_bounds = array<i64: 8, 128>}, {transform_indices = @transform_13, window_bounds = array<i64: 8, 784>}]} {
    %c0 = arith.constant 0 : index
    %c0_0 = arith.constant 0 : index
    %0 = vector.load %arg1[%c0, %c0_0] : memref<8x784xf32, #tpu.memory_space<vmem>>, vector<8x784xf32>
    %1 = arith.truncf %0 : vector<8x784xf32> to vector<8x784xbf16>
    %c0_1 = arith.constant 0 : index
    %c0_2 = arith.constant 0 : index
    %2 = vector.load %arg3[%c0_1, %c0_2] : memref<784x256xbf16, #tpu.memory_space<vmem>>, vector<784x256xbf16>
    %cst = arith.constant dense<0.000000e+00> : vector<8x256xf32>
    %3 = tpu.matmul %1, %2, %cst {dimension_numbers = #tpu.dot_dimension_numbers<[1], [0], [0], [1], [0, 0, 1, 1], [], []>} : vector<8x784xbf16>, vector<784x256xbf16>, vector<8x256xf32> -> vector<8x256xf32>
    %c0_3 = arith.constant 0 : index
    %c0_4 = arith.constant 0 : index
    %4 = vector.load %arg4[%c0_3, %c0_4] : memref<1x256xf32, #tpu.memory_space<vmem>>, vector<1x256xf32>
    %5 = vector.broadcast %4 : vector<1x256xf32> to vector<8x256xf32>
    %6 = arith.addf %3, %5 : vector<8x256xf32>
    %cst_5 = arith.constant 0.000000e+00 : f32
    %7 = vector.broadcast %cst_5 : f32 to vector<8x256xf32>
    %8 = arith.maximumf %6, %7 : vector<8x256xf32>
    %9 = arith.truncf %8 : vector<8x256xf32> to vector<8x256xbf16>
    %c0_6 = arith.constant 0 : index
    %c0_7 = arith.constant 0 : index
    %10 = vector.load %arg5[%c0_6, %c0_7] : memref<256x32xbf16, #tpu.memory_space<vmem>>, vector<256x32xbf16>
    %cst_8 = arith.constant dense<0.000000e+00> : vector<8x32xf32>
    %11 = tpu.matmul %9, %10, %cst_8 {dimension_numbers = #tpu.dot_dimension_numbers<[1], [0], [0], [1], [0, 0, 1, 1], [], []>} : vector<8x256xbf16>, vector<256x32xbf16>, vector<8x32xf32> -> vector<8x32xf32>
    %c0_9 = arith.constant 0 : index
    %c0_10 = arith.constant 0 : index
    %12 = vector.load %arg6[%c0_9, %c0_10] : memref<1x32xf32, #tpu.memory_space<vmem>>, vector<1x32xf32>
    %13 = vector.broadcast %12 : vector<1x32xf32> to vector<8x32xf32>
    %14 = arith.addf %11, %13 : vector<8x32xf32>
    %cst_11 = arith.constant 0.000000e+00 : f32
    %15 = vector.broadcast %cst_11 : f32 to vector<8x32xf32>
    %16 = arith.maximumf %14, %15 : vector<8x32xf32>
    %17 = arith.truncf %16 : vector<8x32xf32> to vector<8x32xbf16>
    %c0_12 = arith.constant 0 : index
    %c0_13 = arith.constant 0 : index
    %18 = vector.load %arg7[%c0_12, %c0_13] : memref<32x64xbf16, #tpu.memory_space<vmem>>, vector<32x64xbf16>
    %cst_14 = arith.constant dense<0.000000e+00> : vector<8x64xf32>
    %19 = tpu.matmul %17, %18, %cst_14 {dimension_numbers = #tpu.dot_dimension_numbers<[1], [0], [0], [1], [0, 0, 1, 1], [], []>} : vector<8x32xbf16>, vector<32x64xbf16>, vector<8x64xf32> -> vector<8x64xf32>
    %c0_15 = arith.constant 0 : index
    %c0_16 = arith.constant 0 : index
    %20 = vector.load %arg8[%c0_15, %c0_16] : memref<1x64xf32, #tpu.memory_space<vmem>>, vector<1x64xf32>
    %21 = vector.broadcast %20 : vector<1x64xf32> to vector<8x64xf32>
    %22 = arith.addf %19, %21 : vector<8x64xf32>
    %23 = vector.extract_strided_slice %22 {offsets = [0, 0], sizes = [8, 32], strides = [1, 1]} : vector<8x64xf32> to vector<8x32xf32>
    %24 = vector.extract_strided_slice %22 {offsets = [0, 32], sizes = [8, 32], strides = [1, 1]} : vector<8x64xf32> to vector<8x32xf32>
    %c0_17 = arith.constant 0 : index
    %c0_18 = arith.constant 0 : index
    %25 = vector.load %arg2[%c0_17, %c0_18] : memref<8x32xf32, #tpu.memory_space<vmem>>, vector<8x32xf32>
    %cst_19 = arith.constant 5.000000e-01 : f32
    %26 = vector.broadcast %cst_19 : f32 to vector<8x32xf32>
    %27 = arith.mulf %26, %24 : vector<8x32xf32>
    %28 = math.exp %27 : vector<8x32xf32>
    %29 = arith.mulf %25, %28 : vector<8x32xf32>
    %30 = arith.addf %23, %29 : vector<8x32xf32>
    %31 = arith.truncf %30 : vector<8x32xf32> to vector<8x32xbf16>
    %c0_20 = arith.constant 0 : index
    %c0_21 = arith.constant 0 : index
    %32 = vector.load %arg9[%c0_20, %c0_21] : memref<32x256xbf16, #tpu.memory_space<vmem>>, vector<32x256xbf16>
    %cst_22 = arith.constant dense<0.000000e+00> : vector<8x256xf32>
    %33 = tpu.matmul %31, %32, %cst_22 {dimension_numbers = #tpu.dot_dimension_numbers<[1], [0], [0], [1], [0, 0, 1, 1], [], []>} : vector<8x32xbf16>, vector<32x256xbf16>, vector<8x256xf32> -> vector<8x256xf32>
    %c0_23 = arith.constant 0 : index
    %c0_24 = arith.constant 0 : index
    %34 = vector.load %arg10[%c0_23, %c0_24] : memref<1x256xf32, #tpu.memory_space<vmem>>, vector<1x256xf32>
    %35 = vector.broadcast %34 : vector<1x256xf32> to vector<8x256xf32>
    %36 = arith.addf %33, %35 : vector<8x256xf32>
    %cst_25 = arith.constant 0.000000e+00 : f32
    %37 = vector.broadcast %cst_25 : f32 to vector<8x256xf32>
    %38 = arith.maximumf %36, %37 : vector<8x256xf32>
    %39 = arith.truncf %38 : vector<8x256xf32> to vector<8x256xbf16>
    %c0_26 = arith.constant 0 : index
    %c0_27 = arith.constant 0 : index
    %40 = vector.load %arg11[%c0_26, %c0_27] : memref<256x784xbf16, #tpu.memory_space<vmem>>, vector<256x784xbf16>
    %cst_28 = arith.constant dense<0.000000e+00> : vector<8x784xf32>
    %41 = tpu.matmul %39, %40, %cst_28 {dimension_numbers = #tpu.dot_dimension_numbers<[1], [0], [0], [1], [0, 0, 1, 1], [], []>} : vector<8x256xbf16>, vector<256x784xbf16>, vector<8x784xf32> -> vector<8x784xf32>
    %c0_29 = arith.constant 0 : index
    %c0_30 = arith.constant 0 : index
    %42 = vector.load %arg12[%c0_29, %c0_30] : memref<1x784xf32, #tpu.memory_space<vmem>>, vector<1x784xf32>
    %43 = vector.broadcast %42 : vector<1x784xf32> to vector<8x784xf32>
    %44 = arith.addf %41, %43 : vector<8x784xf32>
    %45 = arith.negf %44 : vector<8x784xf32>
    %46 = math.exp %45 : vector<8x784xf32>
    %cst_31 = arith.constant 1.000000e+00 : f32
    %47 = vector.broadcast %cst_31 : f32 to vector<8x784xf32>
    %48 = arith.addf %47, %46 : vector<8x784xf32>
    %49 = arith.divf %47, %48 : vector<8x784xf32>
    %50 = arith.truncf %49 : vector<8x784xf32> to vector<8x784xbf16>
    %c0_32 = arith.constant 0 : index
    %c0_33 = arith.constant 0 : index
    %51 = vector.load %arg14[%c0_32, %c0_33] : memref<8x784xbf16, #tpu.memory_space<vmem>>, vector<8x784xbf16>
    tpu.vector_store %arg14[%c0_32, %c0_33], %50 {strides = array<i32>} : memref<8x784xbf16, #tpu.memory_space<vmem>>, vector<8x784xbf16>,
    %c0_34 = arith.constant 0 : index
    %c0_35 = arith.constant 0 : index
    %52 = vector.load %arg13[%c0_34, %c0_35] : memref<8x128xf32, #tpu.memory_space<vmem>>, vector<8x32xf32>
    tpu.vector_store %arg13[%c0_34, %c0_35], %16 {strides = array<i32>} : memref<8x128xf32, #tpu.memory_space<vmem>>, vector<8x32xf32>,
    %c0_36 = arith.constant 0 : index
    %c32 = arith.constant 32 : index
    %53 = vector.load %arg13[%c0_36, %c32] : memref<8x128xf32, #tpu.memory_space<vmem>>, vector<8x64xf32>
    tpu.vector_store %arg13[%c0_36, %c32], %22 {strides = array<i32>} : memref<8x128xf32, #tpu.memory_space<vmem>>, vector<8x64xf32>,
    %cst_37 = arith.constant 0.000000e+00 : f32
    %54 = vector.broadcast %cst_37 : f32 to vector<8x32xf32>
    %c0_38 = arith.constant 0 : index
    %c96 = arith.constant 96 : index
    %55 = vector.load %arg13[%c0_38, %c96] : memref<8x128xf32, #tpu.memory_space<vmem>>, vector<8x32xf32>
    tpu.vector_store %arg13[%c0_38, %c96], %54 {strides = array<i32>} : memref<8x128xf32, #tpu.memory_space<vmem>>, vector<8x32xf32>,
    return
  }
  func.func @transform_0(%arg0: i32) -> (i32, i32) {
    %c0_i32 = arith.constant 0 : i32
    %c0_i32_0 = arith.constant 0 : i32
    return %arg0, %c0_i32 : i32, i32
  }
  func.func @transform_1(%arg0: i32) -> (i32, i32) {
    %c0_i32 = arith.constant 0 : i32
    %c0_i32_0 = arith.constant 0 : i32
    return %arg0, %c0_i32 : i32, i32
  }
  func.func @transform_2(%arg0: i32) -> (i32, i32) {
    %c0_i32 = arith.constant 0 : i32
    %c0_i32_0 = arith.constant 0 : i32
    %c0_i32_1 = arith.constant 0 : i32
    return %c0_i32, %c0_i32_0 : i32, i32
  }
  func.func @transform_3(%arg0: i32) -> (i32, i32) {
    %c0_i32 = arith.constant 0 : i32
    %c0_i32_0 = arith.constant 0 : i32
    %c0_i32_1 = arith.constant 0 : i32
    return %c0_i32, %c0_i32_0 : i32, i32
  }
  func.func @transform_4(%arg0: i32) -> (i32, i32) {
    %c0_i32 = arith.constant 0 : i32
    %c0_i32_0 = arith.constant 0 : i32
    %c0_i32_1 = arith.constant 0 : i32
    return %c0_i32, %c0_i32_0 : i32, i32
  }
  func.func @transform_5(%arg0: i32) -> (i32, i32) {
    %c0_i32 = arith.constant 0 : i32
    %c0_i32_0 = arith.constant 0 : i32
    %c0_i32_1 = arith.constant 0 : i32
    return %c0_i32, %c0_i32_0 : i32, i32
  }
  func.func @transform_6(%arg0: i32) -> (i32, i32) {
    %c0_i32 = arith.constant 0 : i32
    %c0_i32_0 = arith.constant 0 : i32
    %c0_i32_1 = arith.constant 0 : i32
    return %c0_i32, %c0_i32_0 : i32, i32
  }
  func.func @transform_7(%arg0: i32) -> (i32, i32) {
    %c0_i32 = arith.constant 0 : i32
    %c0_i32_0 = arith.constant 0 : i32
    %c0_i32_1 = arith.constant 0 : i32
    return %c0_i32, %c0_i32_0 : i32, i32
  }
  func.func @transform_8(%arg0: i32) -> (i32, i32) {
    %c0_i32 = arith.constant 0 : i32
    %c0_i32_0 = arith.constant 0 : i32
    %c0_i32_1 = arith.constant 0 : i32
    return %c0_i32, %c0_i32_0 : i32, i32
  }
  func.func @transform_9(%arg0: i32) -> (i32, i32) {
    %c0_i32 = arith.constant 0 : i32
    %c0_i32_0 = arith.constant 0 : i32
    %c0_i32_1 = arith.constant 0 : i32
    return %c0_i32, %c0_i32_0 : i32, i32
  }
  func.func @transform_10(%arg0: i32) -> (i32, i32) {
    %c0_i32 = arith.constant 0 : i32
    %c0_i32_0 = arith.constant 0 : i32
    %c0_i32_1 = arith.constant 0 : i32
    return %c0_i32, %c0_i32_0 : i32, i32
  }
  func.func @transform_11(%arg0: i32) -> (i32, i32) {
    %c0_i32 = arith.constant 0 : i32
    %c0_i32_0 = arith.constant 0 : i32
    %c0_i32_1 = arith.constant 0 : i32
    return %c0_i32, %c0_i32_0 : i32, i32
  }
  func.func @transform_12(%arg0: i32) -> (i32, i32) {
    %c0_i32 = arith.constant 0 : i32
    %c0_i32_0 = arith.constant 0 : i32
    return %arg0, %c0_i32 : i32, i32
  }
  func.func @transform_13(%arg0: i32) -> (i32, i32) {
    %c0_i32 = arith.constant 0 : i32
    %c0_i32_0 = arith.constant 0 : i32
    return %arg0, %c0_i32 : i32, i32
  }
}

</mosaic_0001>

<bundles_post_ra>
// kernel: vae_forward.1
= control target key start
LH: loop header
LB: loop body
LE: loop exit
PB: predicated region body
PF: predicated region fallthrough
CT: control target
= control target key end

     0   :  { %s3735_s0 = inlined_call_operand.vmem [shape: f32[8,784], index: 0, kind: input, shape index: {}]   ;;  %s3736_s1 = inlined_call_operand.vmem [shape: f32[8,32], index: 1, kind: input, shape index: {}]   ;;  %s3737_s2 = inlined_call_operand.vmem [shape: bf16[784,256], index: 2, kind: input, shape index: {}]   ;;  %s3738_s3 = inlined_call_operand.vmem [shape: f32[1,256], index: 3, kind: input, shape index: {}]   ;;  %s3739_s4 = inlined_call_operand.vmem [shape: bf16[256,32], index: 4, kind: input, shape index: {}]   ;;  %s3740_s5 = inlined_call_operand.vmem [shape: f32[1,32], index: 5, kind: input, shape index: {}]   ;;  %s3741_s6 = inlined_call_operand.vmem [shape: bf16[32,64], index: 6, kind: input, shape index: {}]   ;;  %s3742_s7 = inlined_call_operand.vmem [shape: f32[1,64], index: 7, kind: input, shape index: {}]   ;;  %s3743_s8 = inlined_call_operand.vmem [shape: bf16[32,256], index: 8, kind: input, shape index: {}]   ;;  %s3744_s9 = inlined_call_operand.vmem [shape: f32[1,256], index: 9, kind: input, shape index: {}]   ;;  %s3745_s10 = inlined_call_operand.vmem [shape: bf16[256,784], index: 10, kind: input, shape index: {}]   ;;  %s3746_s11 = inlined_call_operand.vmem [shape: f32[1,784], index: 11, kind: input, shape index: {}]   ;;  %s3747_s12 = inlined_call_operand.vmem [shape: f32[8,128], index: 12, kind: output, shape index: {0}]   ;;  %s3748_s13 = inlined_call_operand.hbm [shape: bf16[8,784], index: 13, kind: output, shape index: {1}]  }
   0x1   :  { %v2490_v0 = vld [vmem:[%s3737_s2 + $0x74] ss:$8 sps:$4 sm:$0xff]   ;;  %v2492_v1 = vld [vmem:[%s3737_s2 + $0x70] ss:$8 sps:$4 sm:$0xff]   ;;  %v2496_v4 = vld [vmem:[%s3737_s2 + $0x64] ss:$8 sps:$4 sm:$0xff]  }
   0x2   :  { %663 = vmatprep.subr.bf16.mxu0 %v2490_v0  ;;  %v2493_v2 = vld [vmem:[%s3737_s2 + $0x174] ss:$8 sps:$4 sm:$0xff]   ;;  %v2495_v3 = vld [vmem:[%s3737_s2 + $0x170] ss:$8 sps:$4 sm:$0xff]   ;;  %v2498_v5 = vld [vmem:[%s3737_s2 + $0x60] ss:$8 sps:$4 sm:$0xff]  }
   0x3   :  { %664 = vmatpush1.bf16.msra.mxu0 %v2492_v1  ;;  %704 = vmatprep.subr.bf16.mxu1 %v2493_v2  ;;  %v2499_v6 = vld [vmem:[%s3737_s2 + $0x164] ss:$8 sps:$4 sm:$0xff]   ;;  %v2501_v7 = vld [vmem:[%s3737_s2 + $0x160] ss:$8 sps:$4 sm:$0xff]   ;;  %v2502_v8 = vld [vmem:[%s3737_s2 + $0x54] ss:$8 sps:$4 sm:$0xff]  }
   0x4   :  { %705 = vmatpush1.bf16.msra.mxu1 %v2495_v3  ;;  %665 = vmatprep.subr.bf16.mxu0 %v2496_v4  ;;  %v2504_v9 = vld [vmem:[%s3737_s2 + $0x50] ss:$8 sps:$4 sm:$0xff]   ;;  %v2505_v10 = vld [vmem:[%s3737_s2 + $0x154] ss:$8 sps:$4 sm:$0xff]   ;;  %v2508_v11 = vld [vmem:[%s3737_s2 + $0x44] ss:$8 sps:$4 sm:$0xff]  }
   0x5   :  { %706 = vmatprep.subr.bf16.mxu1 %v2499_v6  ;;  %v2507_v12 = vld [vmem:[%s3737_s2 + $0x150] ss:$8 sps:$4 sm:$0xff]   ;;  %v2511_v13 = vld [vmem:[%s3737_s2 + $0x144] ss:$8 sps:$4 sm:$0xff]   ;;  %v2510_v14 = vld [vmem:[%s3737_s2 + $0x40] ss:$8 sps:$4 sm:$0xff]  }
   0x6   :  { %v2514_v15 = vld [vmem:[%s3737_s2 + $0x34] ss:$8 sps:$4 sm:$0xff]   ;;  %v2513_v16 = vld [vmem:[%s3737_s2 + $0x140] ss:$8 sps:$4 sm:$0xff]   ;;  %v2516_v18 = vld [vmem:[%s3737_s2 + $0x30] ss:$8 sps:$4 sm:$0xff]  }
   0x7   :  { %666 = vmatpush1.bf16.msra.mxu0 %v2498_v5  ;;  %v2517_v17 = vld [vmem:[%s3737_s2 + $0x134] ss:$8 sps:$4 sm:$0xff]   ;;  %v2520_v19 = vld [vmem:[%s3737_s2 + $0x24] ss:$8 sps:$4 sm:$0xff]   ;;  %v2519_v20 = vld [vmem:[%s3737_s2 + $0x130] ss:$8 sps:$4 sm:$0xff]  }
   0x8   :  { %667 = vmatprep.subr.bf16.mxu0 %v2502_v8  ;;  %707 = vmatpush1.bf16.msra.mxu1 %v2501_v7  ;;  %v2523_v21 = vld [vmem:[%s3737_s2 + $0x124] ss:$8 sps:$4 sm:$0xff]   ;;  %v2522_v22 = vld [vmem:[%s3737_s2 + $0x20] ss:$8 sps:$4 sm:$0xff]   ;;  %v2526_v23 = vld [vmem:[%s3737_s2 + $0x14] ss:$8 sps:$4 sm:$0xff]  }
   0x9   :  { %708 = vmatprep.subr.bf16.mxu1 %v2505_v10  ;;  %v2525_v24 = vld [vmem:[%s3737_s2 + $0x120] ss:$8 sps:$4 sm:$0xff]   ;;  %v2529_v25 = vld [vmem:[%s3737_s2 + $0x114] ss:$8 sps:$4 sm:$0xff]   ;;  %v2528_v26 = vld [vmem:[%s3737_s2 + $0x10] ss:$8 sps:$4 sm:$0xff]  }
   0xa   :  { %v2532_v27 = vld [vmem:[%s3737_s2 + $0x4] ss:$8 sps:$4 sm:$0xff]   ;;  %v2531_v28 = vld [vmem:[%s3737_s2 + $0x110] ss:$8 sps:$4 sm:$0xff]   ;;  %v2534_v30 = vld [vmem:[%s3737_s2] ss:$8 sps:$4 sm:$0xff]  }
   0xb   :  { %668 = vmatpush1.bf16.msra.mxu0 %v2504_v9  ;;  %v2535_v29 = vld [vmem:[%s3737_s2 + $0x104] ss:$8 sps:$4 sm:$0xff]   ;;  %v2538_v31 = vld [vmem:[%s3737_s2 + $0xf4] ss:$8 sps:$4 sm:$0xff]   ;;  %v2537_v32 = vld [vmem:[%s3737_s2 + $0x100] ss:$8 sps:$4 sm:$0xff]  }
   0xc   :  { %669 = vmatprep.subr.bf16.mxu0 %v2508_v11  ;;  %709 = vmatpush1.bf16.msra.mxu1 %v2507_v12  ;;  %v2541_v33 = vld [vmem:[%s3737_s2 + $0x1f4] ss:$8 sps:$4 sm:$0xff]   ;;  %v2540_v34 = vld [vmem:[%s3737_s2 + $0xf0] ss:$8 sps:$4 sm:$0xff]   ;;  %v2544_v35 = vld [vmem:[%s3737_s2 + $0xe4] ss:$8 sps:$4 sm:$0xff]  }
   0xd   :  { %710 = vmatprep.subr.bf16.mxu1 %v2511_v13  ;;  %v2543_v36 = vld [vmem:[%s3737_s2 + $0x1f0] ss:$8 sps:$4 sm:$0xff]   ;;  %v2547_v37 = vld [vmem:[%s3737_s2 + $0x1e4] ss:$8 sps:$4 sm:$0xff]   ;;  %v2546_v38 = vld [vmem:[%s3737_s2 + $0xe0] ss:$8 sps:$4 sm:$0xff]  }
   0xe   :  { %v2550_v39 = vld [vmem:[%s3737_s2 + $0xd4] ss:$8 sps:$4 sm:$0xff]   ;;  %v2549_v40 = vld [vmem:[%s3737_s2 + $0x1e0] ss:$8 sps:$4 sm:$0xff]   ;;  %v2552_v42 = vld [vmem:[%s3737_s2 + $0xd0] ss:$8 sps:$4 sm:$0xff]  }
   0xf   :  { %670 = vmatpush1.bf16.msra.mxu0 %v2510_v14  ;;  %v2553_v41 = vld [vmem:[%s3737_s2 + $0x1d4] ss:$8 sps:$4 sm:$0xff]   ;;  %v2556_v43 = vld [vmem:[%s3737_s2 + $0xc4] ss:$8 sps:$4 sm:$0xff]   ;;  %v2555_v44 = vld [vmem:[%s3737_s2 + $0x1d0] ss:$8 sps:$4 sm:$0xff]  }
  0x10   :  { %671 = vmatprep.subr.bf16.mxu0 %v2514_v15  ;;  %711 = vmatpush1.bf16.msra.mxu1 %v2513_v16  ;;  %v2559_v45 = vld [vmem:[%s3737_s2 + $0x1c4] ss:$8 sps:$4 sm:$0xff]   ;;  %v2558_v47 = vld [vmem:[%s3737_s2 + $0xc0] ss:$8 sps:$4 sm:$0xff]   ;;  %v2562_v49 = vld [vmem:[%s3737_s2 + $0xb4] ss:$8 sps:$4 sm:$0xff]  }
  0x11   :  { %712 = vmatprep.subr.bf16.mxu1 %v2517_v17  ;;  %v46_v46 = vld [vmem:[%s3735_s0 + $0x8] sm:$0xff]  ;;  %v48_v50 = vld [vmem:[%s3735_s0 + $0x18] sm:$0xff]  ;;  %v45_v4 = vld [vmem:[%s3735_s0] sm:$0xff] }
  0x12   :  { %v53_v48 = vpack.c.bf16 %v46_v46, %v46_v46  ;;  %v2561_v51 = vld [vmem:[%s3737_s2 + $0x1c0] ss:$8 sps:$4 sm:$0xff]   ;;  %v55_v52 = vpack.c.bf16 %v48_v50, %v48_v50  ;;  %v2565_v53 = vld [vmem:[%s3737_s2 + $0x1b4] ss:$8 sps:$4 sm:$0xff]   ;;  %v2564_v54 = vld [vmem:[%s3737_s2 + $0xb0] ss:$8 sps:$4 sm:$0xff]   ;;  %v52_v7 = vpack.c.bf16 %v45_v4, %v45_v4 }
  0x13   :  { %672 = vmatpush1.bf16.msra.mxu0 %v2516_v18  ;;  %v2568_v55 = vld [vmem:[%s3737_s2 + $0xa4] ss:$8 sps:$4 sm:$0xff]   ;;  %v2567_v56 = vld [vmem:[%s3737_s2 + $0x1b0] ss:$8 sps:$4 sm:$0xff]   ;;  %v2570_v58 = vld [vmem:[%s3737_s2 + $0xa0] ss:$8 sps:$4 sm:$0xff]  }
  0x14   :  { %673 = vmatprep.subr.bf16.mxu0 %v2520_v19  ;;  %713 = vmatpush1.bf16.msra.mxu1 %v2519_v20  ;;  %v2571_v57 = vld [vmem:[%s3737_s2 + $0x1a4] ss:$8 sps:$4 sm:$0xff]   ;;  %v2574_v59 = vld [vmem:[%s3737_s2 + $0x94] ss:$8 sps:$4 sm:$0xff]   ;;  %v2573_v60 = vld [vmem:[%s3737_s2 + $0x1a0] ss:$8 sps:$4 sm:$0xff]  }
  0x15   :  { %714 = vmatprep.subr.bf16.mxu1 %v2523_v21  ;;  %695 = vmatprep.mubr.bf16.mxu0 %v53_v48  ;;  %v2577_v61 = vld [vmem:[%s3737_s2 + $0x194] ss:$8 sps:$4 sm:$0xff]   ;;  %v2576_v62 = vld [vmem:[%s3737_s2 + $0x90] ss:$8 sps:$4 sm:$0xff]   ;;  %v2580_v63 = vld [vmem:[%s3737_s2 + $0x84] ss:$8 sps:$4 sm:$0xff]  }
  0x16   :  { %736 = vmatprep.mubr.bf16.mxu1 %v55_v52  ;;  %v2579_v0 = vld [vmem:[%s3737_s2 + $0x190] ss:$8 sps:$4 sm:$0xff]   ;;  %v2582_v1 = vld [vmem:[%s3737_s2 + $0x80] ss:$8 sps:$4 sm:$0xff]   ;;  %v2583_v2 = vld [vmem:[%s3737_s2 + $0x184] ss:$8 sps:$4 sm:$0xff]  }
  0x17   :  { %674 = vmatpush1.bf16.msra.mxu0 %v2522_v22  ;;  %v2585_v3 = vld [vmem:[%s3737_s2 + $0x180] ss:$8 sps:$4 sm:$0xff]   ;;  %v2588_v5 = vld [vmem:[%s3737_s2 + $0x274] ss:$8 sps:$4 sm:$0xff]   ;;  %v2586_v8 = vld [vmem:[%s3737_s2 + $0x270] ss:$8 sps:$4 sm:$0xff]  }
  0x18   :  { %675 = vmatprep.subr.bf16.mxu0 %v2526_v23  ;;  %715 = vmatpush1.bf16.msra.mxu1 %v2525_v24  ;;  %v47_v6 = vld [vmem:[%s3735_s0 + $0x10] sm:$0xff]  ;;  %v2591_v10 = vld [vmem:[%s3737_s2 + $0x264] ss:$8 sps:$4 sm:$0xff]   ;;  %v2589_v13 = vld [vmem:[%s3737_s2 + $0x260] ss:$8 sps:$4 sm:$0xff]  }
  0x19   :  { %716 = vmatprep.subr.bf16.mxu1 %v2529_v25  ;;  %v54_v9 = vpack.c.bf16 %v47_v6, %v47_v6  ;;  %v50_v11 = vld [vmem:[%s3735_s0 + $0x28] sm:$0xff]  ;;  %v2594_v14 = vld [vmem:[%s3737_s2 + $0x254] ss:$8 sps:$4 sm:$0xff]   ;;  %v2592_v15 = vld [vmem:[%s3737_s2 + $0x250] ss:$8 sps:$4 sm:$0xff]  }
  0x1a   :  { %v57_v12 = vpack.c.bf16 %v50_v11, %v50_v11  ;;  %v2597_v16 = vld [vmem:[%s3737_s2 + $0x244] ss:$8 sps:$4 sm:$0xff]   ;;  %v2595_v17 = vld [vmem:[%s3737_s2 + $0x240] ss:$8 sps:$4 sm:$0xff]   ;;  %v2600_v18 = vld [vmem:[%s3737_s2 + $0x234] ss:$8 sps:$4 sm:$0xff]  }
  0x1b   :  { %676 = vmatpush1.bf16.msra.mxu0 %v2528_v26  ;;  %v2598_v19 = vld [vmem:[%s3737_s2 + $0x230] ss:$8 sps:$4 sm:$0xff]   ;;  %v2603_v20 = vld [vmem:[%s3737_s2 + $0x224] ss:$8 sps:$4 sm:$0xff]   ;;  %v2601_v21 = vld [vmem:[%s3737_s2 + $0x220] ss:$8 sps:$4 sm:$0xff]  }
  0x1c   :  { %677 = vmatprep.subr.bf16.mxu0 %v2532_v27  ;;  %717 = vmatpush1.bf16.msra.mxu1 %v2531_v28  ;;  %v2606_v22 = vld [vmem:[%s3737_s2 + $0x214] ss:$8 sps:$4 sm:$0xff]   ;;  %v2604_v23 = vld [vmem:[%s3737_s2 + $0x210] ss:$8 sps:$4 sm:$0xff]   ;;  %v2609_v24 = vld [vmem:[%s3737_s2 + $0x204] ss:$8 sps:$4 sm:$0xff]  }
  0x1d   :  { %718 = vmatprep.subr.bf16.mxu1 %v2535_v29  ;;  %v2607_v25 = vld [vmem:[%s3737_s2 + $0x200] ss:$8 sps:$4 sm:$0xff]   ;;  %v2612_v26 = vld [vmem:[%s3737_s2 + $0x2f4] ss:$8 sps:$4 sm:$0xff]   ;;  %v2610_v27 = vld [vmem:[%s3737_s2 + $0x2f0] ss:$8 sps:$4 sm:$0xff]  }
  0x1e   :  { %v2615_v28 = vld [vmem:[%s3737_s2 + $0x2e4] ss:$8 sps:$4 sm:$0xff]   ;;  %v2613_v29 = vld [vmem:[%s3737_s2 + $0x2e0] ss:$8 sps:$4 sm:$0xff]  }
  0x1f   :  { %678 = vmatpush1.bf16.msra.mxu0 %v2534_v30  ;;  %v2618_v30 = vld [vmem:[%s3737_s2 + $0x2d4] ss:$8 sps:$4 sm:$0xff]  }
  0x20   :  { %679 = vmatprep.subr.bf16.mxu0 %v2538_v31  ;;  %719 = vmatpush1.bf16.msra.mxu1 %v2537_v32  ;;  %v2616_v31 = vld [vmem:[%s3737_s2 + $0x2d0] ss:$8 sps:$4 sm:$0xff]   ;;  %v2621_v32 = vld [vmem:[%s3737_s2 + $0x2c4] ss:$8 sps:$4 sm:$0xff]  }
  0x21   :  { %720 = vmatprep.subr.bf16.mxu1 %v2541_v33  ;;  %v2619_v33 = vld [vmem:[%s3737_s2 + $0x2c0] ss:$8 sps:$4 sm:$0xff]  }
  0x23   :  { %680 = vmatpush2.bf16.msra.mxu0 %v2540_v34  ;;  %v2624_v34 = vld [vmem:[%s3737_s2 + $0x2b4] ss:$8 sps:$4 sm:$0xff]  }
  0x24   :  { %681 = vmatprep.subr.bf16.mxu0 %v2544_v35  ;;  %721 = vmatpush2.bf16.msra.mxu1 %v2543_v36  ;;  %v2622_v35 = vld [vmem:[%s3737_s2 + $0x2b0] ss:$8 sps:$4 sm:$0xff]   ;;  %v2627_v36 = vld [vmem:[%s3737_s2 + $0x2a4] ss:$8 sps:$4 sm:$0xff]  }
  0x25   :  { %722 = vmatprep.subr.bf16.mxu1 %v2547_v37  ;;  %v2625_v37 = vld [vmem:[%s3737_s2 + $0x2a0] ss:$8 sps:$4 sm:$0xff]  }
  0x27   :  { %682 = vmatpush2.bf16.msra.mxu0 %v2546_v38  ;;  %v2630_v38 = vld [vmem:[%s3737_s2 + $0x294] ss:$8 sps:$4 sm:$0xff]  }
  0x28   :  { %683 = vmatprep.subr.bf16.mxu0 %v2550_v39  ;;  %723 = vmatpush2.bf16.msra.mxu1 %v2549_v40  ;;  %v2628_v39 = vld [vmem:[%s3737_s2 + $0x290] ss:$8 sps:$4 sm:$0xff]   ;;  %v2633_v40 = vld [vmem:[%s3737_s2 + $0x284] ss:$8 sps:$4 sm:$0xff]  }
  0x29   :  { %724 = vmatprep.subr.bf16.mxu1 %v2553_v41  ;;  %v2631_v41 = vld [vmem:[%s3737_s2 + $0x280] ss:$8 sps:$4 sm:$0xff]  }
  0x2b   :  { %684 = vmatpush2.bf16.msra.mxu0 %v2552_v42  ;;  %v49_v42 = vld [vmem:[%s3735_s0 + $0x20] sm:$0xff] }
  0x2c   :  { %685 = vmatprep.subr.bf16.mxu0 %v2556_v43  ;;  %725 = vmatpush2.bf16.msra.mxu1 %v2555_v44  ;;  %v2636_v43 = vld [vmem:[%s3737_s2 + $0x304] ss:$8 sps:$4 sm:$0xff]  }
  0x2d   :  { %726 = vmatprep.subr.bf16.mxu1 %v2559_v45 }
  0x2f   :  { %686 = vmatpush2.bf16.msra.mxu0 %v2558_v47 }
  0x30   :  { %687 = vmatprep.subr.bf16.mxu0 %v2562_v49  ;;  %727 = vmatpush2.bf16.msra.mxu1 %v2561_v51 }
  0x31   :  { %728 = vmatprep.subr.bf16.mxu1 %v2565_v53 }
  0x33   :  { %688 = vmatpush2.bf16.msra.mxu0 %v2564_v54 }
  0x34   :  { %689 = vmatprep.subr.bf16.mxu0 %v2568_v55  ;;  %729 = vmatpush2.bf16.msra.mxu1 %v2567_v56 }
  0x35   :  { %730 = vmatprep.subr.bf16.mxu1 %v2571_v57 }
  0x37   :  { %690 = vmatpush2.bf16.msra.mxu0 %v2570_v58 }
  0x38   :  { %691 = vmatprep.subr.bf16.mxu0 %v2574_v59  ;;  %731 = vmatpush2.bf16.msra.mxu1 %v2573_v60 }
  0x39   :  { %732 = vmatprep.subr.bf16.mxu1 %v2577_v61 }
  0x3b   :  { %692 = vmatpush2.bf16.msra.mxu0 %v2576_v62 }
  0x3c   :  { %693 = vmatprep.subr.bf16.mxu0 %v2580_v63  ;;  %733 = vmatpush2.bf16.msra.mxu1 %v2579_v0 }
  0x3d   :  { %734 = vmatprep.subr.bf16.mxu1 %v2583_v2 }
  0x3f   :  { %694 = vmatpush2.bf16.msra.mxu0 %v2582_v1 }
  0x40   :  { %745 = vmatprep.subr.bf16.mxu0 %v2588_v5  ;;  %735 = vmatpush2.bf16.msra.mxu1 %v2585_v3 }
  0x42   :  { %696 = vmatmul.mubr.bf16.vlgmr.msra.gmra.mxu0 %v52_v7 }
  0x43   :  { %746 = vmatpush1.bf16.msra.mxu0 %v2586_v8  ;;  %737 = vmatmul.mubr.bf16.vlgmr.msra.gmra.mxu1 %v54_v9 }
  0x44   :  { %747 = vmatprep.subr.bf16.mxu0 %v2591_v10  ;;  %777 = vmatprep.mubr.bf16.mxu0 %v57_v12 }
  0x47   :  { %748 = vmatpush1.bf16.msra.mxu0 %v2589_v13 }
  0x48   :  { %749 = vmatprep.subr.bf16.mxu0 %v2594_v14 }
  0x4b   :  { %750 = vmatpush1.bf16.msra.mxu0 %v2592_v15 }
  0x4c   :  { %751 = vmatprep.subr.bf16.mxu0 %v2597_v16 }
  0x4f   :  { %752 = vmatpush1.bf16.msra.mxu0 %v2595_v17 }
  0x50   :  { %753 = vmatprep.subr.bf16.mxu0 %v2600_v18 }
  0x53   :  { %754 = vmatpush1.bf16.msra.mxu0 %v2598_v19 }
  0x54   :  { %755 = vmatprep.subr.bf16.mxu0 %v2603_v20 }
  0x57   :  { %756 = vmatpush1.bf16.msra.mxu0 %v2601_v21 }
  0x58   :  { %757 = vmatprep.subr.bf16.mxu0 %v2606_v22 }
  0x5b   :  { %758 = vmatpush1.bf16.msra.mxu0 %v2604_v23 }
  0x5c   :  { %759 = vmatprep.subr.bf16.mxu0 %v2609_v24 }
  0x5f   :  { %760 = vmatpush1.bf16.msra.mxu0 %v2607_v25 }
  0x60   :  { %761 = vmatprep.subr.bf16.mxu0 %v2612_v26 }
  0x63   :  { %762 = vmatpush2.bf16.msra.mxu0 %v2610_v27 }
  0x64   :  { %763 = vmatprep.subr.bf16.mxu0 %v2615_v28 }
  0x67   :  { %764 = vmatpush2.bf16.msra.mxu0 %v2613_v29 }
  0x68   :  { %765 = vmatprep.subr.bf16.mxu0 %v2618_v30 }
  0x6b   :  { %766 = vmatpush2.bf16.msra.mxu0 %v2616_v31 }
  0x6c   :  { %767 = vmatprep.subr.bf16.mxu0 %v2621_v32 }
  0x6f   :  { %768 = vmatpush2.bf16.msra.mxu0 %v2619_v33 }
  0x70   :  { %769 = vmatprep.subr.bf16.mxu0 %v2624_v34 }
  0x73   :  { %770 = vmatpush2.bf16.msra.mxu0 %v2622_v35 }
  0x74   :  { %771 = vmatprep.subr.bf16.mxu0 %v2627_v36 }
  0x77   :  { %772 = vmatpush2.bf16.msra.mxu0 %v2625_v37 }
  0x78   :  { %773 = vmatprep.subr.bf16.mxu0 %v2630_v38 }
  0x7b   :  { %774 = vmatpush2.bf16.msra.mxu0 %v2628_v39 }
  0x7c   :  { %775 = vmatprep.subr.bf16.mxu0 %v2633_v40 }
  0x7d   :  { %19 = vsyncpa [#allocation3], 0  ;;  %v56_v44 = vpack.c.bf16 %v49_v42, %v49_v42  ;;  %v2634_v45 = vld [vmem:[%s3737_s2 + $0x300] ss:$8 sps:$4 sm:$0xff]   ;;  %v2873_v46 = vmov 0   ;;  %v51_v47 = vld [vmem:[%s3735_s0 + $0x30] sm:$0xff]  ;;  %v159_v1 = vlaneseq }
  0x7e   :  { %v58_v48 = vpack.c.bf16 %v51_v47, %v51_v47  ;;  %vm659_vm0 = vcmask 130048   ;;  %v2637_v49 = vld [vmem:[%s3739_s4 + $0x78] sm:$0xff]   ;;  %v2639_v51 = vld [vmem:[%s3739_s4 + $0x70] sm:$0xff]   ;;  %v2641_v53 = vld [vmem:[%s3739_s4 + $0x68] sm:$0xff]   ;;  %v2874_v37 = vmov 0.0   ;;  %vm2875_vm1 = vmmov 0  }
  0x7f   :  { %776 = vmatpush2.bf16.msra.mxu0 %v2631_v41  ;;  %v2638_v50 = vld [vmem:[%s3739_s4 + $0x38] sm:$0xff]   ;;  %2429 = vmatprep.subr.bf16.mxu1 %v2637_v49  ;;  %v2640_v52 = vld [vmem:[%s3739_s4 + $0x30] sm:$0xff]   ;;  %v2642_v54 = vld [vmem:[%s3739_s4 + $0x28] sm:$0xff]   ;;  %v3313_v2 = vshrl.u32 %v159_v1, 7  ;;  %vm1031_vm2 = vcmask 261120   ;;  %s2876_s30 = smov 96  }
  0x80   :  { %800 = vmatprep.subr.bf16.mxu0 %v2636_v43  ;;  %2430 = vmatpush3.bf16.msra.mxu1 %v2638_v50  ;;  %v2643_v55 = vld [vmem:[%s3739_s4 + $0x60] sm:$0xff]   ;;  %v2645_v57 = vld [vmem:[%s3739_s4 + $0x58] sm:$0xff]   ;;  %v2647_v59 = vld [vmem:[%s3739_s4 + $0x50] sm:$0xff]   ;;  %vm2155_vm3 = vcmask 785664   ;;  %vm2157_vm4 = vcmask 1048320   ;;  %vm2148_vm5 = vcmask 125952  }
  0x81   :  { %2431 = vmatprep.subr.bf16.mxu1 %v2639_v51  ;;  %v2644_v56 = vld [vmem:[%s3739_s4 + $0x20] sm:$0xff]   ;;  %v2646_v58 = vld [vmem:[%s3739_s4 + $0x18] sm:$0xff]   ;;  %v2648_v60 = vld [vmem:[%s3739_s4 + $0x10] sm:$0xff]   ;;  %v3316_v3 = vsub.s32 0, %v3313_v2  ;;  %v3322_v5 = vsub.s32 1, %v3313_v2 }
  0x82   :  { %778 = vmatmul.mubr.bf16.vlgmr.msra.gmra.mxu0 %v56_v44  ;;  %v2649_v61 = vld [vmem:[%s3739_s4 + $0x48] sm:$0xff]   ;;  %v2651_v63 = vld [vmem:[%s3739_s4 + $0x40] sm:$0xff]   ;;  %v2655_v49 = vld [vmem:[%s3743_s8 + $0x10] ss:$8 sps:$4 sm:$0xff]  }
  0x83   :  { %801 = vmatpush1.bf16.msra.mxu0 %v2634_v45  ;;  %818 = vmatprep.mubr.bf16.mxu0 %v2873_v46  ;;  %v2650_v62 = vld [vmem:[%s3739_s4 + $0x8] sm:$0xff]   ;;  %v2652_v0 = vld [vmem:[%s3739_s4] sm:$0xff]   ;;  %v2657_v50 = vld [vmem:[%s3743_s8 + $0x14] ss:$8 sps:$4 sm:$0xff]  }
  0x84   :  { %2432 = vmatpush3.bf16.msra.mxu1 %v2640_v52  ;;  %v157_v4 = vld [vmem:[%s3738_s3] sm:$0x3]  ;;  %v2653_v36 = vld [vmem:[%s3741_s6 + $0x8] sm:$0xff]  }
  0x85   :  { %2433 = vmatprep.subr.bf16.mxu1 %v2641_v53  ;;  %v162_v6 = vrot.slane %v157_v4, %v3316_v3  ;;  %v166_v7 = vrot.slane %v157_v4, %v3322_v5  ;;  %v2654_v38 = vld [vmem:[%s3741_s6] sm:$0xff]  }
  0x86   :  { %v2276_v40 = vld [vmem:[%s3740_s5] ss:$0 sm:$0xff]  ;;  %s2877_s5 = smov 32  }
  0x87   :  { %v2293_v51 = vld [vmem:[%s3742_s7] ss:$0 sm:$0xff] }
  0x88   :  { %2434 = vmatpush3.bf16.msra.mxu1 %v2642_v54  ;;  %v2678_v4 = vld [vmem:[%s3745_s10 + $0x124] ss:$28 sps:$4 sm:$0xff]  }
  0x89   :  { %2435 = vmatprep.subr.bf16.mxu1 %v2643_v55 }
  0x8a   :  { %2275 = vmatmul.mubr.msk.bf16.vlgmr.msra.gmra.mxu0 %vm659_vm0, %v58_v48 }
  0x8c   :  { %2436 = vmatpush3.bf16.msra.mxu1 %v2644_v56 }
  0x8d   :  { %2437 = vmatprep.subr.bf16.mxu1 %v2645_v57 }
  0x90   :  { %2438 = vmatpush3.bf16.msra.mxu1 %v2646_v58  ;;  %v2660_v58 = vld [vmem:[%s3743_s8 + $0x4] ss:$8 sps:$4 sm:$0xff]  }
  0x91   :  { %2439 = vmatprep.subr.bf16.mxu1 %v2647_v59  ;;  %v2658_v59 = vld [vmem:[%s3743_s8] ss:$8 sps:$4 sm:$0xff]  }
  0x94   :  { %2440 = vmatpush3.bf16.msra.mxu1 %v2648_v60  ;;  %v2663_v60 = vld [vmem:[%s3745_s10 + $0x18c] ss:$28 sps:$4 sm:$0xff]  }
  0x95   :  { %2441 = vmatprep.subr.bf16.mxu1 %v2649_v61  ;;  %v2664_v61 = vld [vmem:[%s3745_s10 + $0x190] ss:$28 sps:$4 sm:$0xff]  }
  0x98   :  { %2442 = vmatpush3.bf16.msra.mxu1 %v2650_v62  ;;  %v2666_v62 = vld [vmem:[%s3745_s10 + $0x194] ss:$28 sps:$4 sm:$0xff]  }
  0x99   :  { %2443 = vmatprep.subr.bf16.mxu1 %v2651_v63  ;;  %v2672_v63 = vld [vmem:[%s3745_s10 + $0x15c] ss:$28 sps:$4 sm:$0xff]   ;;  %1952 = vmatprep.subr.bf16.mxu0 %v2666_v62 }
  0x9a   :  { %1953 = vmatpush1.bf16.msra.mxu0 %v2664_v61  ;;  %v2739_v61 = vld [vmem:[%s3745_s10 + $0x230] ss:$28 sps:$4 sm:$0xff]   ;;  %v2747_v62 = vld [vmem:[%s3745_s10 + $0x1fc] ss:$28 sps:$4 sm:$0xff]  }
  0x9b   :  { %1954 = vmatprep.subr.bf16.mxu0 %v2672_v63  ;;  %v2750_v63 = vld [vmem:[%s3745_s10 + $0x204] ss:$28 sps:$4 sm:$0xff]  }
  0x9c   :  { %2444 = vmatpush3.bf16.msra.mxu1 %v2652_v0  ;;  %v2670_v0 = vld [vmem:[%s3745_s10 + $0x158] ss:$28 sps:$4 sm:$0xff]  }
  0x9d   :  { %2476 = vmatprep.subr.bf16.mxu1 %v2874_v37 }
  0x9e   :  { %1955 = vmatpush1.bf16.msra.mxu0 %v2670_v0  ;;  %v2745_v0 = vld [vmem:[%s3745_s10 + $0x1f8] ss:$28 sps:$4 sm:$0xff]  }
  0x9f   :  { %1956 = vmatprep.subr.bf16.mxu0 %v2678_v4  ;;  %v2753_v4 = vld [vmem:[%s3745_s10 + $0x1c4] ss:$28 sps:$4 sm:$0xff]  }
 0x102   :  { %v697_v8 = vpop.f32.mrf.mxu0 }
 0x103   :  { %v698_v9 = vadd.f32 %v697_v8, %v162_v6  ;;  %v738_v11 = vpop.f32.mrf.mxu1  ;;  %v2676_v6 = vld [vmem:[%s3745_s10 + $0x120] ss:$28 sps:$4 sm:$0xff]   ;;  %v2682_v8 = vld [vmem:[%s3745_s10 + $0xe8] ss:$28 sps:$4 sm:$0xff]  }
 0x104   :  { %v699_v10 = vpop.f32.mrf.mxu0  ;;  %1957 = vmatpush1.bf16.msra.mxu0 %v2676_v6  ;;  %v2756_v6 = vld [vmem:[%s3745_s10 + $0x1cc] ss:$28 sps:$4 sm:$0xff]  }
 0x105   :  { %v700_v12 = vadd.f32 %v699_v10, %v166_v7  ;;  %v739_v13 = vadd.f32 %v738_v11, %v698_v9  ;;  %v740_v15 = vpop.f32.mrf.mxu1  ;;  %v2684_v7 = vld [vmem:[%s3745_s10 + $0xec] ss:$28 sps:$4 sm:$0xff]   ;;  %v2690_v9 = vld [vmem:[%s3745_s10 + $0xb4] ss:$28 sps:$4 sm:$0xff]   ;;  %v2696_v11 = vld [vmem:[%s3745_s10 + $0x7c] ss:$28 sps:$4 sm:$0xff]  }
 0x106   :  { %v701_v14 = vpop.f32.mrf.mxu0  ;;  %1958 = vmatprep.subr.bf16.mxu0 %v2684_v7  ;;  %v2688_v10 = vld [vmem:[%s3745_s10 + $0xb0] ss:$28 sps:$4 sm:$0xff]   ;;  %v2751_v7 = vld [vmem:[%s3745_s10 + $0x1c0] ss:$28 sps:$4 sm:$0xff]  }
 0x107   :  { %v741_v16 = vadd.f32 %v740_v15, %v700_v12  ;;  %v742_v18 = vpop.f32.mrf.mxu1  ;;  %v2694_v12 = vld [vmem:[%s3745_s10 + $0x78] ss:$28 sps:$4 sm:$0xff]   ;;  %v2700_v14 = vld [vmem:[%s3745_s10 + $0x40] ss:$28 sps:$4 sm:$0xff]   ;;  %v2708_v15 = vld [vmem:[%s3745_s10 + $0xc] ss:$28 sps:$4 sm:$0xff]  }
 0x108   :  { %v702_v17 = vpop.f32.mrf.mxu0  ;;  %1959 = vmatpush1.bf16.msra.mxu0 %v2682_v8  ;;  %v2712_v18 = vld [vmem:[%s3745_s10 + $0x350] ss:$28 sps:$4 sm:$0xff]   ;;  %v2754_v8 = vld [vmem:[%s3745_s10 + $0x1c8] ss:$28 sps:$4 sm:$0xff]  }
 0x109   :  { %v743_v19 = vpop.f32.mrf.mxu1  ;;  %1960 = vmatprep.subr.bf16.mxu0 %v2690_v9  ;;  %v2714_v17 = vld [vmem:[%s3745_s10 + $0x354] ss:$28 sps:$4 sm:$0xff]   ;;  %v2759_v9 = vld [vmem:[%s3745_s10 + $0x19c] ss:$28 sps:$4 sm:$0xff]  }
 0x10a   :  { %v2720_v19 = vld [vmem:[%s3745_s10 + $0x31c] ss:$28 sps:$4 sm:$0xff]  }
 0x10c   :  { %1961 = vmatpush1.bf16.msra.mxu0 %v2688_v10  ;;  %v2760_v10 = vld [vmem:[%s3745_s10 + $0x360] ss:$28 sps:$4 sm:$0xff]  }
 0x10d   :  { %1962 = vmatprep.subr.bf16.mxu0 %v2696_v11  ;;  %v1090_v11 = vld [vmem:[%s3744_s9] sm:$0x3] }
 0x110   :  { %1963 = vmatpush1.bf16.msra.mxu0 %v2694_v12  ;;  %v1095_v12 = vrot.slane %v1090_v11, %v3316_v3 }
 0x142   :  { %v779_v20 = vpop.f32.mrf.mxu0 }
 0x143   :  { %v780_v24 = vadd.f32 %v779_v20, %v739_v13  ;;  %v2702_v13 = vld [vmem:[%s3745_s10 + $0x44] ss:$28 sps:$4 sm:$0xff]   ;;  %v2718_v20 = vld [vmem:[%s3745_s10 + $0x318] ss:$28 sps:$4 sm:$0xff]  }
 0x144   :  { %v781_v21 = vpop.f32.mrf.mxu0  ;;  %1964 = vmatprep.subr.bf16.mxu0 %v2702_v13  ;;  %v1099_v13 = vrot.slane %v1090_v11, %v3322_v5  ;;  %v1314_v11 = vsub.s32 3, %v3313_v2 }
 0x145   :  { %v782_v26 = vadd.f32 %v781_v21, %v741_v16  ;;  %1965 = vmatpush1.bf16.msra.mxu0 %v2700_v14  ;;  %v2706_v16 = vld [vmem:[%s3745_s10 + $0x8] ss:$28 sps:$4 sm:$0xff]  }
 0x146   :  { %v783_v22 = vpop.f32.mrf.mxu0  ;;  %1966 = vmatprep.subr.bf16.mxu0 %v2708_v15  ;;  %v2726_v21 = vld [vmem:[%s3745_s10 + $0x2e4] ss:$28 sps:$4 sm:$0xff]  }
 0x147   :  { %v2724_v22 = vld [vmem:[%s3745_s10 + $0x2e0] ss:$28 sps:$4 sm:$0xff]  }
 0x148   :  { %v784_v23 = vpop.f32.mrf.mxu0 }
 0x149   :  { %1967 = vmatpush1.bf16.msra.mxu0 %v2706_v16  ;;  %v2732_v23 = vld [vmem:[%s3745_s10 + $0x2ac] ss:$28 sps:$4 sm:$0xff]  }
 0x14a   :  { %v820_v25 = vpop.f32.mrf.mxu0  ;;  %1968 = vmatprep.subr.bf16.mxu0 %v2714_v17 }
 0x14b   :  { %v821_v27 = vadd.f32 %v820_v25, %v780_v24  ;;  %v2730_v24 = vld [vmem:[%s3745_s10 + $0x2a8] ss:$28 sps:$4 sm:$0xff]   ;;  %v2738_v25 = vld [vmem:[%s3745_s10 + $0x274] ss:$28 sps:$4 sm:$0xff]  }
 0x14c   :  { %v822_v28 = vpop.f32.mrf.mxu0 }
 0x14d   :  { %v823_v29 = vadd.f32 %v822_v28, %v782_v26  ;;  %v827_v30 = vmax.f32 %v821_v27, 0.0  ;;  %1969 = vmatpush2.bf16.msra.mxu0 %v2712_v18  ;;  %v2736_v26 = vld [vmem:[%s3745_s10 + $0x270] ss:$28 sps:$4 sm:$0xff]   ;;  %v2744_v27 = vld [vmem:[%s3745_s10 + $0x23c] ss:$28 sps:$4 sm:$0xff]  }
 0x14e   :  { %v824_v31 = vpop.f32.mrf.mxu0  ;;  %1970 = vmatprep.subr.bf16.mxu0 %v2720_v19  ;;  %v2742_v28 = vld [vmem:[%s3745_s10 + $0x238] ss:$28 sps:$4 sm:$0xff]  }
 0x14f   :  { %v828_v32 = vmax.f32 %v823_v29, 0.0  ;;  %v829_v35 = vpack.c.bf16 %v827_v30, %v827_v30  ;;  %v1075_v29 = vld [vmem:[%s3736_s1] sm:$0xff] }
 0x150   :  { %v825_v33 = vpop.f32.mrf.mxu0 }
 0x151   :  { %v830_v34 = vpack.c.bf16 %v828_v32, %v828_v32  ;;  %1971 = vmatpush2.bf16.msra.mxu0 %v2718_v20 }
 0x152   :  { %1972 = vmatprep.subr.bf16.mxu0 %v2726_v21 }
 0x153   :  { %998 = vmatprep.mubr.bf16.mxu1 %v830_v34  ;;  %v2661_v34 = vld [vmem:[%s3745_s10 + $0x188] ss:$28 sps:$4 sm:$0xff]  }
 0x154   :  { %999 = vmatmul.mubr.bf16.vlgmr.msra.gmra.mxu1 %v829_v35 }
 0x155   :  { %2477 = vmatpush3.bf16.msra.mxu1 %v2653_v36  ;;  %2480 = vmatprep.mubr.msk.bf16.mxu1 %vm2875_vm1, %v2874_v37  ;;  %v2669_v36 = vld [vmem:[%s3745_s10 + $0x154] ss:$28 sps:$4 sm:$0xff]  }
 0x156   :  { %2478 = vmatprep.subr.bf16.mxu1 %v2874_v37  ;;  %1973 = vmatpush2.bf16.msra.mxu0 %v2724_v22 }
 0x157   :  { %1974 = vmatprep.subr.bf16.mxu0 %v2732_v23  ;;  %v2757_v23 = vld [vmem:[%s3745_s10 + $0x198] ss:$28 sps:$4 sm:$0xff]  }
 0x159   :  { %2479 = vmatpush3.bf16.msra.mxu1 %v2654_v38  ;;  %v2667_v38 = vld [vmem:[%s3745_s10 + $0x150] ss:$28 sps:$4 sm:$0xff]  }
 0x15a   :  { %1137 = vmatprep.subr.bf16.mxu1 %v2657_v50  ;;  %1975 = vmatpush2.bf16.msra.mxu0 %v2730_v24  ;;  %v2703_v50 = vld [vmem:[%s3745_s10] ss:$28 sps:$4 sm:$0xff]  }
 0x15b   :  { %1976 = vmatprep.subr.bf16.mxu0 %v2738_v25  ;;  %v2761_v24 = vld [vmem:[%s3745_s10 + $0x1a0] ss:$28 sps:$4 sm:$0xff]  }
 0x15e   :  { %1977 = vmatpush2.bf16.msra.mxu0 %v2736_v26  ;;  %v2764_v26 = vld [vmem:[%s3745_s10 + $0x164] ss:$28 sps:$4 sm:$0xff]  }
 0x15f   :  { %1978 = vmatprep.subr.bf16.mxu0 %v2744_v27  ;;  %v2765_v27 = vld [vmem:[%s3745_s10 + $0x328] ss:$28 sps:$4 sm:$0xff]  }
 0x162   :  { %1979 = vmatpush2.bf16.msra.mxu0 %v2742_v28  ;;  %v2762_v28 = vld [vmem:[%s3745_s10 + $0x160] ss:$28 sps:$4 sm:$0xff]  }
 0x163   :  { %1980 = vmatprep.subr.bf16.mxu0 %v2750_v63  ;;  %v2809_v63 = vld [vmem:[%s3745_s10 + $0x278] ss:$28 sps:$4 sm:$0xff]  }
 0x214   :  { %v2445_v39 = vpop.f32.mrf.mxu1 }
 0x216   :  { %v2446_v41 = vpop.f32.mrf.mxu1 }
 0x217   :  { %v2447_v42 = vadd.f32 %v2446_v41, %v2445_v39  ;;  %v2675_v39 = vld [vmem:[%s3745_s10 + $0x11c] ss:$28 sps:$4 sm:$0xff]  }
 0x218   :  { %v2448_v43 = vpop.f32.mrf.mxu1  ;;  %v2679_v41 = vld [vmem:[%s3745_s10 + $0xe0] ss:$28 sps:$4 sm:$0xff]  }
 0x219   :  { %v1001_v44 = vadd.f32 %v2447_v42, %v2276_v40  ;;  %v2673_v40 = vld [vmem:[%s3745_s10 + $0x118] ss:$28 sps:$4 sm:$0xff]   ;;  %v2687_v42 = vld [vmem:[%s3745_s10 + $0xac] ss:$28 sps:$4 sm:$0xff]  }
 0x21a   :  { %v2449_v45 = vpop.f32.mrf.mxu1  ;;  %v2685_v43 = vld [vmem:[%s3745_s10 + $0xa8] ss:$28 sps:$4 sm:$0xff]  }
 0x21b   :  { %v1006_v47 = vmax.f32 %v1001_v44, 0.0  ;;  %v2693_v44 = vld [vmem:[%s3745_s10 + $0x74] ss:$28 sps:$4 sm:$0xff]  }
 0x21c   :  { %v2691_v45 = vld [vmem:[%s3745_s10 + $0x70] ss:$28 sps:$4 sm:$0xff]  }
 0x21d   :  { %v1007_v48 = vpack.c.bf16 %v1006_v47, %v1006_v47  ;;  %2150 = vst.msk [vmem:[%s3747_s12] sm:$0xff] %vm1031_vm2, %v1006_v47  ;;  %v2699_v47 = vld [vmem:[%s3745_s10 + $0x3c] ss:$28 sps:$4 sm:$0xff]  }
 0x21f   :  { %2481 = vmatmul.mubr.msk.bf16.vlgmr.msra.gmra.mxu1 %vm1031_vm2, %v1007_v48  ;;  %v2697_v48 = vld [vmem:[%s3745_s10 + $0x38] ss:$28 sps:$4 sm:$0xff]  }
 0x220   :  { %1157 = vmatprep.mubr.bf16.mxu1 %v2873_v46  ;;  %1138 = vmatpush1.bf16.msra.mxu1 %v2655_v49  ;;  %v2705_v49 = vld [vmem:[%s3745_s10 + $0x4] ss:$28 sps:$4 sm:$0xff]  }
 0x221   :  { %1139 = vmatprep.subr.bf16.mxu1 %v2660_v58  ;;  %v2735_v58 = vld [vmem:[%s3745_s10 + $0x26c] ss:$28 sps:$4 sm:$0xff]  }
 0x224   :  { %1140 = vmatpush1.bf16.msra.mxu1 %v2658_v59  ;;  %v2733_v59 = vld [vmem:[%s3745_s10 + $0x268] ss:$28 sps:$4 sm:$0xff]  }
 0x225   :  { %1911 = vmatprep.subr.bf16.mxu1 %v2663_v60  ;;  %v2741_v60 = vld [vmem:[%s3745_s10 + $0x234] ss:$28 sps:$4 sm:$0xff]  }
 0x2df   :  { %v1069_v52 = vpop.f32.mrf.mxu1 }
 0x2e0   :  { %v3353_v53 = vadd.f32 %v2293_v51, %v1069_v52  ;;  %v2711_v51 = vld [vmem:[%s3745_s10 + $0x34c] ss:$28 sps:$4 sm:$0xff]  }
 0x2e1   :  { %v2482_v54 = vpop.f32.mrf.mxu1  ;;  %v2709_v52 = vld [vmem:[%s3745_s10 + $0x348] ss:$28 sps:$4 sm:$0xff]  }
 0x2e2   :  { %v1076_v46 = vmul.f32 0.5, %v3353_v53  ;;  %v2715_v54 = vld [vmem:[%s3745_s10 + $0x310] ss:$28 sps:$4 sm:$0xff]  }
 0x2e3   :  { %v1072_v55 = vpop.f32.mrf.mxu1 }
 0x2e4   :  { %v1077_v56 = vmul.f32 1.442695, %v1076_v46  ;;  %v2723_v46 = vld [vmem:[%s3745_s10 + $0x2dc] ss:$28 sps:$4 sm:$0xff]  }
 0x2e5   :  { %v2483_v57 = vpop.f32.mrf.mxu1  ;;  %v2721_v55 = vld [vmem:[%s3745_s10 + $0x2d8] ss:$28 sps:$4 sm:$0xff]  }
 0x2e6   :  { %2821 = vpow2.f32 %v1077_v56  ;;  %v2729_v56 = vld [vmem:[%s3745_s10 + $0x2a4] ss:$28 sps:$4 sm:$0xff]  }
 0x2e7   :  { %v2727_v57 = vld [vmem:[%s3745_s10 + $0x2a0] ss:$28 sps:$4 sm:$0xff]  }
 0x2f3   :  { %v2822_v1 = vpop.eup %2821 }
 0x2f4   :  { %1080 = vrot.lane.b32.xlu0 %v2822_v1, %s2876_s30  ;;  %v2748_v1 = vld [vmem:[%s3745_s10 + $0x200] ss:$28 sps:$4 sm:$0xff]  }
 0x2f5   :  { %1981 = vmatpush2.bf16.msra.mxu0 %v2748_v1  ;;  %v2812_v1 = vld [vmem:[%s3745_s10 + $0x240] ss:$28 sps:$4 sm:$0xff]  }
 0x2f6   :  { %1982 = vmatprep.subr.bf16.mxu0 %v2756_v6  ;;  %v2815_v6 = vld [vmem:[%s3745_s10 + $0x208] ss:$28 sps:$4 sm:$0xff]  }
 0x2f8   :  { %2152 = vrot.lane.b32.xlu0 %v3353_v53, %s2877_s5 }
 0x2f9   :  { %1983 = vmatpush2.bf16.msra.mxu0 %v2754_v8  ;;  %v2818_v8 = vld [vmem:[%s3745_s10 + $0x1d0] ss:$28 sps:$4 sm:$0xff]  }
 0x2fa   :  { %2454 = vmatprep.subr.bf16.mxu0 %v2760_v10  ;;  %v1298_v10 = vld [vmem:[%s3746_s11] sm:$0x7f] }
 0x366   :  { %v1081_v30 = vpop.permute.xlu0 %1080 }
 0x367   :  { %v1083_v31 = vmul.f32 %v1081_v30, %v1075_v29  ;;  %v2766_v29 = vld [vmem:[%s3745_s10 + $0x168] ss:$28 sps:$4 sm:$0xff]  }
 0x368   :  { %v2769_v30 = vld [vmem:[%s3745_s10 + $0x12c] ss:$28 sps:$4 sm:$0xff]  }
 0x369   :  { %v1084_v32 = vadd.f32 %v1083_v31, %v3353_v53  ;;  %v2717_v53 = vld [vmem:[%s3745_s10 + $0x314] ss:$28 sps:$4 sm:$0xff]  }
 0x36a   :  { %v2153_v33 = vpop.permute.xlu0 %2152  ;;  %v2770_v31 = vld [vmem:[%s3745_s10 + $0x2f0] ss:$28 sps:$4 sm:$0xff]  }
 0x36b   :  { %v1085_v35 = vpack.c.bf16 %v1084_v32, %v1084_v32  ;;  %2156 = vst.msk [vmem:[%s3747_s12] sm:$0xff] %vm2155_vm3, %v2153_v33  ;;  %v2767_v32 = vld [vmem:[%s3745_s10 + $0x128] ss:$28 sps:$4 sm:$0xff]   ;;  %v2771_v33 = vld [vmem:[%s3745_s10 + $0x130] ss:$28 sps:$4 sm:$0xff]  }
 0x36c   :  { %2158 = vst.msk [vmem:[%s3747_s12] sm:$0xff] %vm2157_vm4, %v2874_v37  ;;  %v2681_v37 = vld [vmem:[%s3745_s10 + $0xe4] ss:$28 sps:$4 sm:$0xff]  }
 0x36d   :  { %2301 = vmatmul.mubr.msk.bf16.vlgmr.msra.gmra.mxu1 %vm1031_vm2, %v1085_v35  ;;  %v2775_v35 = vld [vmem:[%s3745_s10 + $0x2b8] ss:$28 sps:$4 sm:$0xff]  }
 0x36e   :  { %1912 = vmatpush1.bf16.msra.mxu1 %v2661_v34  ;;  %v2774_v34 = vld [vmem:[%s3745_s10 + $0xf4] ss:$28 sps:$4 sm:$0xff]  }
 0x36f   :  { %1913 = vmatprep.subr.bf16.mxu1 %v2669_v36  ;;  %v2772_v36 = vld [vmem:[%s3745_s10 + $0xf0] ss:$28 sps:$4 sm:$0xff]  }
 0x372   :  { %1914 = vmatpush1.bf16.msra.mxu1 %v2667_v38  ;;  %v2776_v38 = vld [vmem:[%s3745_s10 + $0xf8] ss:$28 sps:$4 sm:$0xff]  }
 0x373   :  { %1915 = vmatprep.subr.bf16.mxu1 %v2675_v39  ;;  %v2779_v39 = vld [vmem:[%s3745_s10 + $0xbc] ss:$28 sps:$4 sm:$0xff]  }
 0x376   :  { %1916 = vmatpush1.bf16.msra.mxu1 %v2673_v40  ;;  %v2780_v40 = vld [vmem:[%s3745_s10 + $0x280] ss:$28 sps:$4 sm:$0xff]  }
 0x377   :  { %1917 = vmatprep.subr.bf16.mxu1 %v2681_v37  ;;  %v2777_v37 = vld [vmem:[%s3745_s10 + $0xb8] ss:$28 sps:$4 sm:$0xff]  }
 0x37a   :  { %1918 = vmatpush1.bf16.msra.mxu1 %v2679_v41  ;;  %v2781_v41 = vld [vmem:[%s3745_s10 + $0xc0] ss:$28 sps:$4 sm:$0xff]  }
 0x37b   :  { %1919 = vmatprep.subr.bf16.mxu1 %v2687_v42  ;;  %v2784_v42 = vld [vmem:[%s3745_s10 + $0x84] ss:$28 sps:$4 sm:$0xff]  }
 0x37e   :  { %1920 = vmatpush1.bf16.msra.mxu1 %v2685_v43  ;;  %v2785_v43 = vld [vmem:[%s3745_s10 + $0x248] ss:$28 sps:$4 sm:$0xff]  }
 0x37f   :  { %1921 = vmatprep.subr.bf16.mxu1 %v2693_v44  ;;  %v2782_v44 = vld [vmem:[%s3745_s10 + $0x80] ss:$28 sps:$4 sm:$0xff]  }
 0x382   :  { %1922 = vmatpush1.bf16.msra.mxu1 %v2691_v45  ;;  %v2786_v45 = vld [vmem:[%s3745_s10 + $0x88] ss:$28 sps:$4 sm:$0xff]  }
 0x383   :  { %1923 = vmatprep.subr.bf16.mxu1 %v2699_v47  ;;  %v2789_v47 = vld [vmem:[%s3745_s10 + $0x4c] ss:$28 sps:$4 sm:$0xff]  }
 0x386   :  { %1924 = vmatpush1.bf16.msra.mxu1 %v2697_v48  ;;  %v2790_v48 = vld [vmem:[%s3745_s10 + $0x210] ss:$28 sps:$4 sm:$0xff]  }
 0x387   :  { %1925 = vmatprep.subr.bf16.mxu1 %v2705_v49  ;;  %v2787_v49 = vld [vmem:[%s3745_s10 + $0x48] ss:$28 sps:$4 sm:$0xff]  }
 0x38a   :  { %1926 = vmatpush1.bf16.msra.mxu1 %v2703_v50  ;;  %v2791_v50 = vld [vmem:[%s3745_s10 + $0x50] ss:$28 sps:$4 sm:$0xff]  }
 0x38b   :  { %1927 = vmatprep.subr.bf16.mxu1 %v2711_v51  ;;  %v2794_v51 = vld [vmem:[%s3745_s10 + $0x14] ss:$28 sps:$4 sm:$0xff]  }
 0x38e   :  { %1928 = vmatpush2.bf16.msra.mxu1 %v2709_v52  ;;  %v2795_v52 = vld [vmem:[%s3745_s10 + $0x1d8] ss:$28 sps:$4 sm:$0xff]  }
 0x38f   :  { %1929 = vmatprep.subr.bf16.mxu1 %v2717_v53  ;;  %v2792_v53 = vld [vmem:[%s3745_s10 + $0x10] ss:$28 sps:$4 sm:$0xff]  }
 0x392   :  { %1930 = vmatpush2.bf16.msra.mxu1 %v2715_v54  ;;  %v2796_v54 = vld [vmem:[%s3745_s10 + $0x18] ss:$28 sps:$4 sm:$0xff]  }
 0x393   :  { %1931 = vmatprep.subr.bf16.mxu1 %v2723_v46  ;;  %v2799_v46 = vld [vmem:[%s3745_s10 + $0x35c] ss:$28 sps:$4 sm:$0xff]  }
 0x396   :  { %1932 = vmatpush2.bf16.msra.mxu1 %v2721_v55  ;;  %v2797_v55 = vld [vmem:[%s3745_s10 + $0x358] ss:$28 sps:$4 sm:$0xff]  }
 0x397   :  { %1933 = vmatprep.subr.bf16.mxu1 %v2729_v56  ;;  %v2802_v56 = vld [vmem:[%s3745_s10 + $0x324] ss:$28 sps:$4 sm:$0xff]  }
 0x39a   :  { %1934 = vmatpush2.bf16.msra.mxu1 %v2727_v57  ;;  %v2800_v57 = vld [vmem:[%s3745_s10 + $0x320] ss:$28 sps:$4 sm:$0xff]  }
 0x39b   :  { %1935 = vmatprep.subr.bf16.mxu1 %v2735_v58  ;;  %v2805_v58 = vld [vmem:[%s3745_s10 + $0x2ec] ss:$28 sps:$4 sm:$0xff]  }
 0x39e   :  { %1936 = vmatpush2.bf16.msra.mxu1 %v2733_v59  ;;  %v2803_v59 = vld [vmem:[%s3745_s10 + $0x2e8] ss:$28 sps:$4 sm:$0xff]  }
 0x39f   :  { %1937 = vmatprep.subr.bf16.mxu1 %v2741_v60  ;;  %v2808_v60 = vld [vmem:[%s3745_s10 + $0x2b4] ss:$28 sps:$4 sm:$0xff]  }
 0x3a2   :  { %1938 = vmatpush2.bf16.msra.mxu1 %v2739_v61  ;;  %v2806_v61 = vld [vmem:[%s3745_s10 + $0x2b0] ss:$28 sps:$4 sm:$0xff]  }
 0x3a3   :  { %1939 = vmatprep.subr.bf16.mxu1 %v2747_v62  ;;  %v2811_v62 = vld [vmem:[%s3745_s10 + $0x27c] ss:$28 sps:$4 sm:$0xff]  }
 0x3a6   :  { %1940 = vmatpush2.bf16.msra.mxu1 %v2745_v0  ;;  %v2814_v0 = vld [vmem:[%s3745_s10 + $0x244] ss:$28 sps:$4 sm:$0xff]  }
 0x3a7   :  { %1941 = vmatprep.subr.bf16.mxu1 %v2753_v4  ;;  %v2817_v4 = vld [vmem:[%s3745_s10 + $0x20c] ss:$28 sps:$4 sm:$0xff]  }
 0x3aa   :  { %1942 = vmatpush2.bf16.msra.mxu1 %v2751_v7  ;;  %v2820_v7 = vld [vmem:[%s3745_s10 + $0x1d4] ss:$28 sps:$4 sm:$0xff]   ;;  %s2878_s10 = smov [#allocation2]  }
 0x3ab   :  { %1993 = vmatprep.subr.bf16.mxu1 %v2759_v9  ;;  %v1310_v9 = vsub.s32 2, %v3313_v2  ;;  %s2167_s11 = sshll.u32 %s2878_s10, 4  ;;  %s2168_s11 = int_to_ptr.vmem [resolvable:$true] %s2167_s11 }
 0x3ac   :  { %s2851_s2 = scalar_lea.vmem %s2168_s11, 448  ;;  %p2856_p1 = scmp.lt.s32.totalorder %s2168_s11, %s2168_s11 }
 0x3ad   :  { %p2852_p0 = scmp.ne.s32.totalorder %s2168_s11, %s2851_s2  ;;  %p2857_p2 = scmp.lt.s32.totalorder %s2851_s2, %s2851_s2 }
 0x3af   :  { %p2858_p3 = por %p2857_p2, %p2856_p1 }
 0x3b1   :  { %p2859_p4 = pnand %p2858_p3, %p2852_p0 }
 0x42d   :  { %v1159_v14 = vpop.f32.mrf.mxu1 }
 0x42e   :  { %v1160_v15 = vadd.f32 %v1159_v14, %v1095_v12  ;;  %v1303_v12 = vrot.slane %v1298_v10, %v3316_v3  ;;  %v1307_v14 = vrot.slane %v1298_v10, %v3322_v5 }
 0x42f   :  { %v1161_v16 = vpop.f32.mrf.mxu1 }
 0x430   :  { %v1162_v17 = vadd.f32 %v1161_v16, %v1099_v13  ;;  %v1166_v18 = vmax.f32 %v1160_v15, 0.0  ;;  %v1311_v13 = vrot.slane %v1298_v10, %v1310_v9  ;;  %v1315_v15 = vrot.slane %v1298_v10, %v1314_v11 }
 0x431   :  { %v1163_v19 = vpop.f32.mrf.mxu1 }
 0x432   :  { %v1167_v20 = vmax.f32 %v1162_v17, 0.0  ;;  %v3584_v25 = vpack.c.bf16 %v1166_v18, %v1166_v18 }
 0x433   :  { %v1164_v21 = vpop.f32.mrf.mxu1 }
 0x434   :  { %v1169_v22 = vpack.c.bf16 %v1167_v20, %v1167_v20 }
 0x436   :  { %1943 = vmatprep.mubr.bf16.mxu1 %v1169_v22  ;;  %1984 = vmatprep.mubr.bf16.mxu0 %v1169_v22 }
 0x437   :  { %1944 = vmatmul.mubr.bf16.vlgmr.msra.gmra.mxu1 %v3584_v25  ;;  %1985 = vmatmul.mubr.bf16.vlgmr.msra.gmra.mxu0 %v3584_v25 }
 0x438   :  { %1994 = vmatpush1.bf16.msra.mxu1 %v2757_v23  ;;  %2455 = vmatpush3.bf16.msra.mxu0 %v2761_v24 }
 0x439   :  { %2025 = vmatprep.mubr.bf16.mxu1 %v1169_v22  ;;  %2066 = vmatprep.mubr.bf16.mxu0 %v1169_v22 }
 0x43a   :  { %1995 = vmatprep.subr.bf16.mxu1 %v2764_v26  ;;  %2456 = vmatprep.subr.bf16.mxu0 %v2765_v27 }
 0x43c   :  { %1996 = vmatpush1.bf16.msra.mxu1 %v2762_v28  ;;  %2457 = vmatpush3.bf16.msra.mxu0 %v2766_v29 }
 0x43d   :  { %1997 = vmatprep.subr.bf16.mxu1 %v2769_v30  ;;  %2458 = vmatprep.subr.bf16.mxu0 %v2770_v31 }
 0x440   :  { %1998 = vmatpush1.bf16.msra.mxu1 %v2767_v32  ;;  %2459 = vmatpush3.bf16.msra.mxu0 %v2771_v33 }
 0x441   :  { %1999 = vmatprep.subr.bf16.mxu1 %v2774_v34  ;;  %2460 = vmatprep.subr.bf16.mxu0 %v2775_v35 }
 0x444   :  { %2000 = vmatpush1.bf16.msra.mxu1 %v2772_v36  ;;  %2461 = vmatpush3.bf16.msra.mxu0 %v2776_v38 }
 0x445   :  { %2001 = vmatprep.subr.bf16.mxu1 %v2779_v39  ;;  %2462 = vmatprep.subr.bf16.mxu0 %v2780_v40  ;;  %v1326_v39 = vsub.s32 6, %v3313_v2 }
 0x448   :  { %2002 = vmatpush1.bf16.msra.mxu1 %v2777_v37  ;;  %2463 = vmatpush3.bf16.msra.mxu0 %v2781_v41  ;;  %v1327_v37 = vrot.slane %v1298_v10, %v1326_v39 }
 0x449   :  { %2003 = vmatprep.subr.bf16.mxu1 %v2784_v42  ;;  %2464 = vmatprep.subr.bf16.mxu0 %v2785_v43 }
 0x44c   :  { %2004 = vmatpush1.bf16.msra.mxu1 %v2782_v44  ;;  %2465 = vmatpush3.bf16.msra.mxu0 %v2786_v45 }
 0x44d   :  { %2005 = vmatprep.subr.bf16.mxu1 %v2789_v47  ;;  %2466 = vmatprep.subr.bf16.mxu0 %v2790_v48 }
 0x450   :  { %2006 = vmatpush1.bf16.msra.mxu1 %v2787_v49  ;;  %2467 = vmatpush3.bf16.msra.mxu0 %v2791_v50 }
 0x451   :  { %2007 = vmatprep.subr.bf16.mxu1 %v2794_v51  ;;  %2468 = vmatprep.subr.bf16.mxu0 %v2795_v52 }
 0x454   :  { %2008 = vmatpush1.bf16.msra.mxu1 %v2792_v53  ;;  %2469 = vmatpush3.bf16.msra.mxu0 %v2796_v54 }
 0x455   :  { %2009 = vmatprep.subr.bf16.mxu1 %v2799_v46 }
 0x457   :  { %2067 = vmatmul.mubr.bf16.vlgmr.msra.gmra.mxu0 %v3584_v25 }
 0x458   :  { %2010 = vmatpush2.bf16.msra.mxu1 %v2797_v55  ;;  %v1318_v55 = vsub.s32 4, %v3313_v2 }
 0x459   :  { %2011 = vmatprep.subr.bf16.mxu1 %v2802_v56  ;;  %v1322_v56 = vsub.s32 5, %v3313_v2 }
 0x45c   :  { %2012 = vmatpush2.bf16.msra.mxu1 %v2800_v57  ;;  %v1319_v57 = vrot.slane %v1298_v10, %v1318_v55 }
 0x45d   :  { %2013 = vmatprep.subr.bf16.mxu1 %v2805_v58  ;;  %v1323_v58 = vrot.slane %v1298_v10, %v1322_v56 }
 0x460   :  { %2014 = vmatpush2.bf16.msra.mxu1 %v2803_v59 }
 0x461   :  { %2015 = vmatprep.subr.bf16.mxu1 %v2808_v60 }
 0x464   :  { %2016 = vmatpush2.bf16.msra.mxu1 %v2806_v61 }
 0x465   :  { %2017 = vmatprep.subr.bf16.mxu1 %v2811_v62 }
 0x468   :  { %2018 = vmatpush2.bf16.msra.mxu1 %v2809_v63 }
 0x469   :  { %2019 = vmatprep.subr.bf16.mxu1 %v2814_v0 }
 0x46c   :  { %2020 = vmatpush2.bf16.msra.mxu1 %v2812_v1 }
 0x46d   :  { %2021 = vmatprep.subr.bf16.mxu1 %v2817_v4 }
 0x470   :  { %2022 = vmatpush2.bf16.msra.mxu1 %v2815_v6 }
 0x471   :  { %2023 = vmatprep.subr.bf16.mxu1 %v2820_v7 }
 0x474   :  { %2024 = vmatpush2.bf16.msra.mxu1 %v2818_v8 }
 0x477   :  { %2026 = vmatmul.mubr.bf16.vlgmr.msra.gmra.mxu1 %v3584_v25 }
 0x4f7   :  { %v1945_v16 = vpop.f32.mrf.mxu1  ;;  %v1986_v17 = vpop.f32.mrf.mxu0 }
 0x4f8   :  { %v1946_v18 = vadd.f32 %v1945_v16, %v1303_v12  ;;  %v1987_v19 = vadd.f32 %v1986_v17, %v1311_v13 }
 0x4f9   :  { %v1947_v20 = vpop.f32.mrf.mxu1  ;;  %v1988_v21 = vpop.f32.mrf.mxu0 }
 0x4fa   :  { %v2414_v22 = vmul.f32 -1.442695, %v1946_v18  ;;  %v2416_v23 = vmul.f32 -1.442695, %v1987_v19  ;;  %v1948_v24 = vadd.f32 %v1947_v20, %v1307_v14  ;;  %v1989_v25 = vadd.f32 %v1988_v21, %v1315_v15 }
 0x4fb   :  { %v1949_v26 = vpop.f32.mrf.mxu1  ;;  %v1990_v27 = vpop.f32.mrf.mxu0 }
 0x4fc   :  { %2823 = vpow2.f32 %v2414_v22  ;;  %v2415_v28 = vmul.f32 -1.442695, %v1948_v24  ;;  %v2417_v29 = vmul.f32 -1.442695, %v1989_v25 }
 0x4fd   :  { %2825 = vpow2.f32 %v2416_v23  ;;  %v1950_v3 = vpop.f32.mrf.mxu1  ;;  %v1991_v30 = vpop.f32.mrf.mxu0 }
 0x4fe   :  { %2827 = vpow2.f32 %v2415_v28 }
 0x4ff   :  { %2829 = vpow2.f32 %v2417_v29 }
 0x509   :  { %v2824_v5 = vpop.eup %2823 }
 0x50a   :  { %v2826_v31 = vpop.eup %2825  ;;  %v2095_v32 = vadd.f32 1.0, %v2824_v5 }
 0x50b   :  { %v2828_v33 = vpop.eup %2827  ;;  %v2097_v34 = vadd.f32 1.0, %v2826_v31 }
 0x50c   :  { %v2830_v35 = vpop.eup %2829  ;;  %2831 = vrcp.f32 %v2095_v32  ;;  %v2096_v36 = vadd.f32 1.0, %v2828_v33 }
 0x50d   :  { %2833 = vrcp.f32 %v2097_v34  ;;  %v2098_v38 = vadd.f32 1.0, %v2830_v35 }
 0x50e   :  { %2835 = vrcp.f32 %v2096_v36 }
 0x50f   :  { %2837 = vrcp.f32 %v2098_v38 }
 0x517   :  { %v2470_v40 = vpop.f32.mrf.mxu0 }
 0x519   :  { %v2832_v41 = vpop.eup %2831  ;;  %v2471_v42 = vpop.f32.mrf.mxu0 }
 0x51a   :  { %v2834_v43 = vpop.eup %2833  ;;  %v2472_v44 = vadd.f32 %v2471_v42, %v2470_v40 }
 0x51b   :  { %v2836_v45 = vpop.eup %2835  ;;  %v2473_v47 = vpop.f32.mrf.mxu0 }
 0x51c   :  { %v2838_v48 = vpop.eup %2837  ;;  %v2069_v49 = vadd.f32 %v2472_v44, %v1327_v37  ;;  %v2425_v50 = vpack.c.bf16 %v2836_v45, %v2832_v41 }
 0x51d   :  { %v2474_v51 = vpop.f32.mrf.mxu0  ;;  %v2426_v52 = vpack.c.bf16 %v2838_v48, %v2834_v43 }
 0x51e   :  { %v2420_v53 = vmul.f32 -1.442695, %v2069_v49  ;;  %2145 = vst [vmem:[#allocation2] sm:$0xff] %v2425_v50 }
 0x51f   :  { %2146 = vst [vmem:[#allocation2 + $0x8] sm:$0xff] %v2426_v52 }
 0x520   :  { %2839 = vpow2.f32 %v2420_v53 }
 0x52d   :  { %v2840_v54 = vpop.eup %2839 }
 0x52e   :  { %v2101_v46 = vadd.f32 1.0, %v2840_v54 }
 0x530   :  { %2841 = vrcp.f32 %v2101_v46 }
 0x537   :  { %v2027_v59 = vpop.f32.mrf.mxu1 }
 0x538   :  { %v2028_v60 = vadd.f32 %v2027_v59, %v1319_v57 }
 0x539   :  { %v2029_v61 = vpop.f32.mrf.mxu1 }
 0x53a   :  { %v2418_v62 = vmul.f32 -1.442695, %v2028_v60  ;;  %v2030_v63 = vadd.f32 %v2029_v61, %v1323_v58 }
 0x53b   :  { %v2031_v0 = vpop.f32.mrf.mxu1 }
 0x53c   :  { %2843 = vpow2.f32 %v2418_v62  ;;  %v2419_v1 = vmul.f32 -1.442695, %v2030_v63 }
 0x53d   :  { %v2842_v4 = vpop.eup %2841  ;;  %v2032_v6 = vpop.f32.mrf.mxu1 }
 0x53e   :  { %2845 = vpow2.f32 %v2419_v1  ;;  %v2428_v7 = vpack.c.bf16 %v2842_v4, %v2842_v4 }
 0x540   :  { %2149 = vst.msk [vmem:[#allocation2 + $0x18] sm:$0xf] %vm2148_vm5, %v2428_v7 }
 0x549   :  { %v2844_v8 = vpop.eup %2843 }
 0x54a   :  { %v2099_v9 = vadd.f32 1.0, %v2844_v8 }
 0x54b   :  { %v2846_v11 = vpop.eup %2845 }
 0x54c   :  { %v2100_v2 = vadd.f32 1.0, %v2846_v11  ;;  %2847 = vrcp.f32 %v2099_v9 }
 0x54e   :  { %2849 = vrcp.f32 %v2100_v2 }
 0x559   :  { %v2848_v10 = vpop.eup %2847 }
 0x55b   :  { %v2850_v12 = vpop.eup %2849 }
 0x55c   :  { %v2427_v13 = vpack.c.bf16 %v2850_v12, %v2848_v10 }
 0x55e   :  { %2147 = vst [vmem:[#allocation2 + $0x10] sm:$0xff] %v2427_v13 }
 0x55f   :  { %2862 = shalt.err (!%p2859_p4)
}
 0x560   :  { %2170 = dma.vmem_to_hbm [thread:$0]  %s2168_s11, 448, %s3748_s13, [#allocation3]  }
 0x561   :  { %2871 = dma.done.wait [#allocation3], 448  }
 0x562   :  { %2872 = vsyncadd [#allocation3], 4294966848 }
 0x563   :  { %2176 = vsyncpa [#allocation3], 1 }

</bundles_post_ra>
